<compile_context>
chip_gen: v7x
topology: tpu7x:2x2x1
jax: 0.10.0
libtpu: 0.0.40
codegen_flags: <defaults>
</compile_context>

<pallas_src>
import functools
import math

import jax
import jax.numpy as jnp
from jax.experimental import pallas as pl


# ----------------------------- small config -----------------------------------
VOCAB = 100
MAX_POS = 16
TYPE_VOCAB = 2
HIDDEN = 32
NUM_HEADS = 2
HEAD_DIM = HIDDEN // NUM_HEADS
INTERMEDIATE = 64
NUM_LAYERS = 2
LN_EPS = 1e-12


# ----------------------------- in-kernel helpers -------------------------------
def _layernorm(x, gamma, beta, eps=LN_EPS):
    mu = jnp.mean(x, axis=-1, keepdims=True)
    var = jnp.mean((x - mu) ** 2, axis=-1, keepdims=True)
    return (x - mu) * jax.lax.rsqrt(var + eps) * gamma + beta


# ----------------------------- fused Pallas kernel ------------------------------
def bert_fused_kernel(
    x_ref,                     # (B*S, H)  summed embeddings (word + pos + type)
    emb_g_ref, emb_b_ref,      # (1, H)
    wqkv_ref, bqkv_ref,        # (L, H, 3H), (L, 1, 3H)   fused QKV
    wo_ref, bo_ref,            # (L, nh, hd, H), (L, 1, H) per-head output projection
    ln1g_ref, ln1b_ref,        # (L, 1, H)
    wi_ref, bi_ref,            # (L, H, I), (L, 1, I)
    wo2_ref, bo2_ref,          # (L, I, H), (L, 1, H)
    ln2g_ref, ln2b_ref,        # (L, 1, H)
    wp_ref, bp_ref,            # (H, H), (1, H)            pooler
    hid_ref, pool_ref,         # outputs: (B, S, H), (B, H)
    *, batch, seq, num_heads, head_dim, num_layers,
):
    hidden = num_heads * head_dim
    scale = 1.0 / math.sqrt(head_dim)

    # embedding LayerNorm on the batch-folded (B*S, H) hidden state
    x = _layernorm(x_ref[...], emb_g_ref[...], emb_b_ref[...])

    # statically unrolled layer loop; all layer weights stay resident in VMEM
    for l in range(num_layers):
        # --- self attention: fused QKV projection (one MXU push + one bias add) ---
        qkv = jnp.dot(x, wqkv_ref[l], preferred_element_type=jnp.float32) + bqkv_ref[l]

        # per-head attention; heads are folded back via accumulation into the
        # output projection (no lane concatenate of per-head contexts)
        attn = bo_ref[l]                                           # (1, H) broadcasts over rows
        for h in range(num_heads):
            lo = h * head_dim
            q3 = qkv[:, 0 * hidden + lo: 0 * hidden + lo + head_dim].reshape(batch, seq, head_dim)
            k3 = qkv[:, 1 * hidden + lo: 1 * hidden + lo + head_dim].reshape(batch, seq, head_dim)
            v3 = qkv[:, 2 * hidden + lo: 2 * hidden + lo + head_dim].reshape(batch, seq, head_dim)

            scores = jnp.einsum("bqd,bkd->bqk", q3, k3,
                                preferred_element_type=jnp.float32) * scale   # (B, S, S)
            m = jnp.max(scores, axis=-1, keepdims=True)
            e = jnp.exp(scores - m)
            probs = e * pl.reciprocal(jnp.sum(e, axis=-1, keepdims=True), approx=True)
            ctx = jnp.einsum("bqk,bkd->bqd", probs, v3,
                             preferred_element_type=jnp.float32)              # (B, S, hd)

            attn = attn + jnp.dot(ctx.reshape(batch * seq, head_dim), wo_ref[l, h],
                                  preferred_element_type=jnp.float32)

        x = _layernorm(x + attn, ln1g_ref[l], ln1b_ref[l])

        # --- feed-forward ---
        inter = jnp.dot(x, wi_ref[l], preferred_element_type=jnp.float32) + bi_ref[l]
        inter = jax.nn.gelu(inter, approximate=True)  # TODO(synk): HF BERT uses exact erf-GELU
        ffn = jnp.dot(inter, wo2_ref[l], preferred_element_type=jnp.float32) + bo2_ref[l]
        x = _layernorm(x + ffn, ln2g_ref[l], ln2b_ref[l])

    # --- outputs: last_hidden_state and fused pooler on the CLS rows ---
    x3 = x.reshape(batch, seq, hidden)
    hid_ref[...] = x3
    cls = x3[:, 0, :]                                              # (B, H)
    pool_ref[...] = jnp.tanh(
        jnp.dot(cls, wp_ref[...], preferred_element_type=jnp.float32) + bp_ref[...]
    )


def bert_fused_forward(params, summed):
    """summed: (B, S, H) float32 summed embeddings -> (last_hidden (B,S,H), pooled (B,H))."""
    B, S, H = summed.shape
    x2 = summed.reshape(B * S, H)                                  # fold batch into matmul rows
    kernel = functools.partial(
        bert_fused_kernel,
        batch=B, seq=S, num_heads=NUM_HEADS, head_dim=HEAD_DIM, num_layers=NUM_LAYERS,
    )
    # single invocation, no grid: every operand is a full-array VMEM block
    last_hidden, pooled = pl.pallas_call(
        kernel,
        out_shape=(
            jax.ShapeDtypeStruct((B, S, H), jnp.float32),
            jax.ShapeDtypeStruct((B, H), jnp.float32),
        ),
    )(
        x2,
        params["emb_ln_g"], params["emb_ln_b"],
        params["w_qkv"], params["b_qkv"],
        params["w_o"], params["b_o"],
        params["ln1_g"], params["ln1_b"],
        params["w_i"], params["b_i"],
        params["w_o2"], params["b_o2"],
        params["ln2_g"], params["ln2_b"],
        params["pool_w"], params["pool_b"],
    )
    return last_hidden, pooled


# ----------------------------- parameter init ----------------------------------
def init_params(key):
    def nrm(k, shape, scale=0.02):
        return (scale * jax.random.normal(k, shape)).astype(jnp.float32)

    k = jax.random.split(key, 8)
    H, I, L, NH, HD = HIDDEN, INTERMEDIATE, NUM_LAYERS, NUM_HEADS, HEAD_DIM
    params = {
        "word_emb": nrm(k[0], (VOCAB, H)),
        "pos_emb": nrm(k[1], (MAX_POS, H)),
        "type_emb": nrm(k[2], (TYPE_VOCAB, H)),
        "emb_ln_g": jnp.ones((1, H), jnp.float32),
        "emb_ln_b": jnp.zeros((1, H), jnp.float32),
        "pool_w": nrm(k[3], (H, H)),
        "pool_b": jnp.zeros((1, H), jnp.float32),
        # per-layer weights stacked along a leading L axis (all resident in VMEM)
        "w_qkv": nrm(k[4], (L, H, 3 * H)),            # columns = [Wq | Wk | Wv], head-major within each
        "b_qkv": jnp.zeros((L, 1, 3 * H), jnp.float32),
        "w_o": nrm(k[5], (L, NH, HD, H)),             # per-head output projection (accumulated over heads)
        "b_o": jnp.zeros((L, 1, H), jnp.float32),
        "ln1_g": jnp.ones((L, 1, H), jnp.float32),
        "ln1_b": jnp.zeros((L, 1, H), jnp.float32),
        "w_i": nrm(k[6], (L, H, I)),
        "b_i": jnp.zeros((L, 1, I), jnp.float32),
        "w_o2": nrm(k[7], (L, I, H)),
        "b_o2": jnp.zeros((L, 1, H), jnp.float32),
        "ln2_g": jnp.ones((L, 1, H), jnp.float32),
        "ln2_b": jnp.zeros((L, 1, H), jnp.float32),
    }
    return params


# ----------------------------- BERT_MODEL forward -------------------------------
@functools.partial(jax.jit, static_argnames=("returnembed",))
def bert_model_forward(params, text, returnembed=False):
    """text: (B, S) int32 token ids.  Mirrors BERT_MODEL.forward."""
    B, S = text.shape

    # embeddings (token-id gather is plain-JAX glue; everything else is in-kernel)
    word = jnp.take(params["word_emb"], text, axis=0)              # (B, S, H)
    pos = params["pos_emb"][:S][None, :, :]                        # (1, S, H)
    typ = params["type_emb"][0][None, None, :]                     # (1, 1, H) token_type=0
    summed = word + pos + typ

    last_hidden_state, pooler_output = bert_fused_forward(params, summed)

    if returnembed:
        return {"embeddings": last_hidden_state, "cls": pooler_output}
    return pooler_output


# ----------------------------- main ---------------------------------------------
if __name__ == "__main__":
    B, S = 2, 8
    key = jax.random.PRNGKey(0)
    k_params, k_ids = jax.random.split(key)

    params = init_params(k_params)
    text = jax.random.randint(k_ids, (B, S), 0, VOCAB, dtype=jnp.int32)

    # default path: pooler_output
    pooled = bert_model_forward(params, text, returnembed=False)
    pooled = jax.block_until_ready(pooled)
    assert pooled.shape == (B, HIDDEN) and pooled.dtype == jnp.float32

    # returnembed path
    res = bert_model_forward(params, text, returnembed=True)
    res = jax.block_until_ready(res)
    assert res["embeddings"].shape == (B, S, HIDDEN)
    assert res["cls"].shape == (B, HIDDEN)

    print("KERNEL_OK")
</pallas_src>

<mosaic_0001>
module attributes {stable_mosaic.version = 11 : i64} {
  func.func @bert_fused_kernel(%arg0: memref<16x32xf32, #tpu.memory_space<vmem>>, %arg1: memref<1x32xf32, #tpu.memory_space<vmem>>, %arg2: memref<1x32xf32, #tpu.memory_space<vmem>>, %arg3: memref<2x32x96xf32, #tpu.memory_space<vmem>>, %arg4: memref<2x1x96xf32, #tpu.memory_space<vmem>>, %arg5: memref<2x2x16x32xf32, #tpu.memory_space<vmem>>, %arg6: memref<2x1x32xf32, #tpu.memory_space<vmem>>, %arg7: memref<2x1x32xf32, #tpu.memory_space<vmem>>, %arg8: memref<2x1x32xf32, #tpu.memory_space<vmem>>, %arg9: memref<2x32x64xf32, #tpu.memory_space<vmem>>, %arg10: memref<2x1x64xf32, #tpu.memory_space<vmem>>, %arg11: memref<2x64x32xf32, #tpu.memory_space<vmem>>, %arg12: memref<2x1x32xf32, #tpu.memory_space<vmem>>, %arg13: memref<2x1x32xf32, #tpu.memory_space<vmem>>, %arg14: memref<2x1x32xf32, #tpu.memory_space<vmem>>, %arg15: memref<32x32xf32, #tpu.memory_space<vmem>>, %arg16: memref<1x32xf32, #tpu.memory_space<vmem>>, %arg17: memref<2x8x32xf32, #tpu.memory_space<vmem>>, %arg18: memref<2x32xf32, #tpu.memory_space<vmem>>) attributes {dimension_semantics = [], scalar_prefetch = 0 : i64, scratch_operands = 0 : i64, tpu.core_type = #tpu.core_type<tc>} {
    %c0 = arith.constant 0 : index
    %c0_0 = arith.constant 0 : index
    %0 = vector.load %arg0[%c0, %c0_0] : memref<16x32xf32, #tpu.memory_space<vmem>>, vector<16x32xf32>
    %c0_1 = arith.constant 0 : index
    %c0_2 = arith.constant 0 : index
    %1 = vector.load %arg1[%c0_1, %c0_2] : memref<1x32xf32, #tpu.memory_space<vmem>>, vector<1x32xf32>
    %c0_3 = arith.constant 0 : index
    %c0_4 = arith.constant 0 : index
    %2 = vector.load %arg2[%c0_3, %c0_4] : memref<1x32xf32, #tpu.memory_space<vmem>>, vector<1x32xf32>
    %cst = arith.constant dense<0.000000e+00> : vector<16xf32>
    %3 = vector.multi_reduction <add>, %0, %cst [1] : vector<16x32xf32> to vector<16xf32>
    %4 = vector.shape_cast %3 : vector<16xf32> to vector<16x1xf32>
    %cst_5 = arith.constant 3.200000e+01 : f32
    %5 = vector.broadcast %cst_5 : f32 to vector<16x1xf32>
    %6 = arith.divf %4, %5 : vector<16x1xf32>
    %7 = vector.broadcast %6 : vector<16x1xf32> to vector<16x32xf32>
    %8 = arith.subf %0, %7 : vector<16x32xf32>
    %9 = arith.mulf %8, %8 : vector<16x32xf32>
    %cst_6 = arith.constant dense<0.000000e+00> : vector<16xf32>
    %10 = vector.multi_reduction <add>, %9, %cst_6 [1] : vector<16x32xf32> to vector<16xf32>
    %11 = vector.shape_cast %10 : vector<16xf32> to vector<16x1xf32>
    %cst_7 = arith.constant 3.200000e+01 : f32
    %12 = vector.broadcast %cst_7 : f32 to vector<16x1xf32>
    %13 = arith.divf %11, %12 : vector<16x1xf32>
    %14 = vector.broadcast %6 : vector<16x1xf32> to vector<16x32xf32>
    %15 = arith.subf %0, %14 : vector<16x32xf32>
    %cst_8 = arith.constant 9.99999996E-13 : f32
    %16 = vector.broadcast %cst_8 : f32 to vector<16x1xf32>
    %17 = arith.addf %13, %16 : vector<16x1xf32>
    %18 = math.rsqrt %17 : vector<16x1xf32>
    %19 = vector.broadcast %18 : vector<16x1xf32> to vector<16x32xf32>
    %20 = arith.mulf %15, %19 : vector<16x32xf32>
    %21 = vector.broadcast %1 : vector<1x32xf32> to vector<16x32xf32>
    %22 = arith.mulf %20, %21 : vector<16x32xf32>
    %23 = vector.broadcast %2 : vector<1x32xf32> to vector<16x32xf32>
    %24 = arith.addf %22, %23 : vector<16x32xf32>
    %c0_9 = arith.constant 0 : index
    %c0_10 = arith.constant 0 : index
    %c0_11 = arith.constant 0 : index
    %25 = vector.load %arg3[%c0_9, %c0_10, %c0_11] : memref<2x32x96xf32, #tpu.memory_space<vmem>>, vector<1x32x96xf32>
    %26 = vector.shape_cast %25 : vector<1x32x96xf32> to vector<32x96xf32>
    %cst_12 = arith.constant dense<0.000000e+00> : vector<16x96xf32>
    %27 = tpu.matmul %24, %26, %cst_12 {dimension_numbers = #tpu.dot_dimension_numbers<[1], [0], [0], [1], [0, 0, 1, 1], [], []>} : vector<16x32xf32>, vector<32x96xf32>, vector<16x96xf32> -> vector<16x96xf32>
    %c0_13 = arith.constant 0 : index
    %c0_14 = arith.constant 0 : index
    %c0_15 = arith.constant 0 : index
    %28 = vector.load %arg4[%c0_13, %c0_14, %c0_15] : memref<2x1x96xf32, #tpu.memory_space<vmem>>, vector<1x1x96xf32>
    %29 = vector.shape_cast %28 : vector<1x1x96xf32> to vector<1x96xf32>
    %30 = vector.broadcast %29 : vector<1x96xf32> to vector<16x96xf32>
    %31 = arith.addf %27, %30 : vector<16x96xf32>
    %c0_16 = arith.constant 0 : index
    %c0_17 = arith.constant 0 : index
    %c0_18 = arith.constant 0 : index
    %32 = vector.load %arg6[%c0_16, %c0_17, %c0_18] : memref<2x1x32xf32, #tpu.memory_space<vmem>>, vector<1x1x32xf32>
    %33 = vector.shape_cast %32 : vector<1x1x32xf32> to vector<1x32xf32>
    %34 = vector.extract_strided_slice %31 {offsets = [0, 0], sizes = [16, 16], strides = [1, 1]} : vector<16x96xf32> to vector<16x16xf32>
    %35 = vector.shape_cast %34 : vector<16x16xf32> to vector<2x8x16xf32>
    %36 = vector.extract_strided_slice %31 {offsets = [0, 32], sizes = [16, 16], strides = [1, 1]} : vector<16x96xf32> to vector<16x16xf32>
    %37 = vector.shape_cast %36 : vector<16x16xf32> to vector<2x8x16xf32>
    %38 = vector.extract_strided_slice %31 {offsets = [0, 64], sizes = [16, 16], strides = [1, 1]} : vector<16x96xf32> to vector<16x16xf32>
    %39 = vector.shape_cast %38 : vector<16x16xf32> to vector<2x8x16xf32>
    "tpu.trace_start"() <{level = 10 : i32, message = "bqd,bkd->bqk"}> : () -> ()
    %cst_19 = arith.constant dense<0.000000e+00> : vector<2x8x8xf32>
    %40 = tpu.matmul %35, %37, %cst_19 {dimension_numbers = #tpu.dot_dimension_numbers<[2], [2], [1], [1], [0, 0, 0, 1, 1, 1], [0], [0]>} : vector<2x8x16xf32>, vector<2x8x16xf32>, vector<2x8x8xf32> -> vector<2x8x8xf32>
    "tpu.trace_stop"() : () -> ()
    %cst_20 = arith.constant 2.500000e-01 : f32
    %41 = vector.broadcast %cst_20 : f32 to vector<2x8x8xf32>
    %42 = arith.mulf %40, %41 : vector<2x8x8xf32>
    %cst_21 = arith.constant dense<0xFF800000> : vector<2x8xf32>
    %43 = vector.multi_reduction <maximumf>, %42, %cst_21 [2] : vector<2x8x8xf32> to vector<2x8xf32>
    %44 = vector.shape_cast %43 : vector<2x8xf32> to vector<2x8x1xf32>
    %45 = vector.broadcast %44 : vector<2x8x1xf32> to vector<2x8x8xf32>
    %46 = arith.subf %42, %45 : vector<2x8x8xf32>
    %47 = math.exp %46 : vector<2x8x8xf32>
    %cst_22 = arith.constant dense<0.000000e+00> : vector<2x8xf32>
    %48 = vector.multi_reduction <add>, %47, %cst_22 [2] : vector<2x8x8xf32> to vector<2x8xf32>
    %49 = vector.shape_cast %48 : vector<2x8xf32> to vector<2x8x1xf32>
    %50 = tpu.reciprocal %49 {approx = true} : vector<2x8x1xf32> -> vector<2x8x1xf32>
    %51 = vector.broadcast %50 : vector<2x8x1xf32> to vector<2x8x8xf32>
    %52 = arith.mulf %47, %51 : vector<2x8x8xf32>
    "tpu.trace_start"() <{level = 10 : i32, message = "bqk,bkd->bqd"}> : () -> ()
    %cst_23 = arith.constant dense<0.000000e+00> : vector<2x8x16xf32>
    %53 = tpu.matmul %52, %39, %cst_23 {dimension_numbers = #tpu.dot_dimension_numbers<[2], [1], [1], [2], [0, 0, 0, 1, 1, 2], [0], [0]>} : vector<2x8x8xf32>, vector<2x8x16xf32>, vector<2x8x16xf32> -> vector<2x8x16xf32>
    "tpu.trace_stop"() : () -> ()
    %54 = vector.shape_cast %53 : vector<2x8x16xf32> to vector<16x16xf32>
    %c0_24 = arith.constant 0 : index
    %c0_25 = arith.constant 0 : index
    %c0_26 = arith.constant 0 : index
    %c0_27 = arith.constant 0 : index
    %55 = vector.load %arg5[%c0_24, %c0_25, %c0_26, %c0_27] : memref<2x2x16x32xf32, #tpu.memory_space<vmem>>, vector<1x1x16x32xf32>
    %56 = vector.shape_cast %55 : vector<1x1x16x32xf32> to vector<16x32xf32>
    %cst_28 = arith.constant dense<0.000000e+00> : vector<16x32xf32>
    %57 = tpu.matmul %54, %56, %cst_28 {dimension_numbers = #tpu.dot_dimension_numbers<[1], [0], [0], [1], [0, 0, 1, 1], [], []>} : vector<16x16xf32>, vector<16x32xf32>, vector<16x32xf32> -> vector<16x32xf32>
    %58 = vector.broadcast %33 : vector<1x32xf32> to vector<16x32xf32>
    %59 = arith.addf %58, %57 : vector<16x32xf32>
    %60 = vector.extract_strided_slice %31 {offsets = [0, 16], sizes = [16, 16], strides = [1, 1]} : vector<16x96xf32> to vector<16x16xf32>
    %61 = vector.shape_cast %60 : vector<16x16xf32> to vector<2x8x16xf32>
    %62 = vector.extract_strided_slice %31 {offsets = [0, 48], sizes = [16, 16], strides = [1, 1]} : vector<16x96xf32> to vector<16x16xf32>
    %63 = vector.shape_cast %62 : vector<16x16xf32> to vector<2x8x16xf32>
    %64 = vector.extract_strided_slice %31 {offsets = [0, 80], sizes = [16, 16], strides = [1, 1]} : vector<16x96xf32> to vector<16x16xf32>
    %65 = vector.shape_cast %64 : vector<16x16xf32> to vector<2x8x16xf32>
    "tpu.trace_start"() <{level = 10 : i32, message = "bqd,bkd->bqk"}> : () -> ()
    %cst_29 = arith.constant dense<0.000000e+00> : vector<2x8x8xf32>
    %66 = tpu.matmul %61, %63, %cst_29 {dimension_numbers = #tpu.dot_dimension_numbers<[2], [2], [1], [1], [0, 0, 0, 1, 1, 1], [0], [0]>} : vector<2x8x16xf32>, vector<2x8x16xf32>, vector<2x8x8xf32> -> vector<2x8x8xf32>
    "tpu.trace_stop"() : () -> ()
    %cst_30 = arith.constant 2.500000e-01 : f32
    %67 = vector.broadcast %cst_30 : f32 to vector<2x8x8xf32>
    %68 = arith.mulf %66, %67 : vector<2x8x8xf32>
    %cst_31 = arith.constant dense<0xFF800000> : vector<2x8xf32>
    %69 = vector.multi_reduction <maximumf>, %68, %cst_31 [2] : vector<2x8x8xf32> to vector<2x8xf32>
    %70 = vector.shape_cast %69 : vector<2x8xf32> to vector<2x8x1xf32>
    %71 = vector.broadcast %70 : vector<2x8x1xf32> to vector<2x8x8xf32>
    %72 = arith.subf %68, %71 : vector<2x8x8xf32>
    %73 = math.exp %72 : vector<2x8x8xf32>
    %cst_32 = arith.constant dense<0.000000e+00> : vector<2x8xf32>
    %74 = vector.multi_reduction <add>, %73, %cst_32 [2] : vector<2x8x8xf32> to vector<2x8xf32>
    %75 = vector.shape_cast %74 : vector<2x8xf32> to vector<2x8x1xf32>
    %76 = tpu.reciprocal %75 {approx = true} : vector<2x8x1xf32> -> vector<2x8x1xf32>
    %77 = vector.broadcast %76 : vector<2x8x1xf32> to vector<2x8x8xf32>
    %78 = arith.mulf %73, %77 : vector<2x8x8xf32>
    "tpu.trace_start"() <{level = 10 : i32, message = "bqk,bkd->bqd"}> : () -> ()
    %cst_33 = arith.constant dense<0.000000e+00> : vector<2x8x16xf32>
    %79 = tpu.matmul %78, %65, %cst_33 {dimension_numbers = #tpu.dot_dimension_numbers<[2], [1], [1], [2], [0, 0, 0, 1, 1, 2], [0], [0]>} : vector<2x8x8xf32>, vector<2x8x16xf32>, vector<2x8x16xf32> -> vector<2x8x16xf32>
    "tpu.trace_stop"() : () -> ()
    %80 = vector.shape_cast %79 : vector<2x8x16xf32> to vector<16x16xf32>
    %c0_34 = arith.constant 0 : index
    %c1 = arith.constant 1 : index
    %c0_35 = arith.constant 0 : index
    %c0_36 = arith.constant 0 : index
    %81 = vector.load %arg5[%c0_34, %c1, %c0_35, %c0_36] : memref<2x2x16x32xf32, #tpu.memory_space<vmem>>, vector<1x1x16x32xf32>
    %82 = vector.shape_cast %81 : vector<1x1x16x32xf32> to vector<16x32xf32>
    %cst_37 = arith.constant dense<0.000000e+00> : vector<16x32xf32>
    %83 = tpu.matmul %80, %82, %cst_37 {dimension_numbers = #tpu.dot_dimension_numbers<[1], [0], [0], [1], [0, 0, 1, 1], [], []>} : vector<16x16xf32>, vector<16x32xf32>, vector<16x32xf32> -> vector<16x32xf32>
    %84 = arith.addf %59, %83 : vector<16x32xf32>
    %85 = arith.addf %24, %84 : vector<16x32xf32>
    %c0_38 = arith.constant 0 : index
    %c0_39 = arith.constant 0 : index
    %c0_40 = arith.constant 0 : index
    %86 = vector.load %arg7[%c0_38, %c0_39, %c0_40] : memref<2x1x32xf32, #tpu.memory_space<vmem>>, vector<1x1x32xf32>
    %87 = vector.shape_cast %86 : vector<1x1x32xf32> to vector<1x32xf32>
    %c0_41 = arith.constant 0 : index
    %c0_42 = arith.constant 0 : index
    %c0_43 = arith.constant 0 : index
    %88 = vector.load %arg8[%c0_41, %c0_42, %c0_43] : memref<2x1x32xf32, #tpu.memory_space<vmem>>, vector<1x1x32xf32>
    %89 = vector.shape_cast %88 : vector<1x1x32xf32> to vector<1x32xf32>
    %cst_44 = arith.constant dense<0.000000e+00> : vector<16xf32>
    %90 = vector.multi_reduction <add>, %85, %cst_44 [1] : vector<16x32xf32> to vector<16xf32>
    %91 = vector.shape_cast %90 : vector<16xf32> to vector<16x1xf32>
    %cst_45 = arith.constant 3.200000e+01 : f32
    %92 = vector.broadcast %cst_45 : f32 to vector<16x1xf32>
    %93 = arith.divf %91, %92 : vector<16x1xf32>
    %94 = vector.broadcast %93 : vector<16x1xf32> to vector<16x32xf32>
    %95 = arith.subf %85, %94 : vector<16x32xf32>
    %96 = arith.mulf %95, %95 : vector<16x32xf32>
    %cst_46 = arith.constant dense<0.000000e+00> : vector<16xf32>
    %97 = vector.multi_reduction <add>, %96, %cst_46 [1] : vector<16x32xf32> to vector<16xf32>
    %98 = vector.shape_cast %97 : vector<16xf32> to vector<16x1xf32>
    %cst_47 = arith.constant 3.200000e+01 : f32
    %99 = vector.broadcast %cst_47 : f32 to vector<16x1xf32>
    %100 = arith.divf %98, %99 : vector<16x1xf32>
    %101 = vector.broadcast %93 : vector<16x1xf32> to vector<16x32xf32>
    %102 = arith.subf %85, %101 : vector<16x32xf32>
    %cst_48 = arith.constant 9.99999996E-13 : f32
    %103 = vector.broadcast %cst_48 : f32 to vector<16x1xf32>
    %104 = arith.addf %100, %103 : vector<16x1xf32>
    %105 = math.rsqrt %104 : vector<16x1xf32>
    %106 = vector.broadcast %105 : vector<16x1xf32> to vector<16x32xf32>
    %107 = arith.mulf %102, %106 : vector<16x32xf32>
    %108 = vector.broadcast %87 : vector<1x32xf32> to vector<16x32xf32>
    %109 = arith.mulf %107, %108 : vector<16x32xf32>
    %110 = vector.broadcast %89 : vector<1x32xf32> to vector<16x32xf32>
    %111 = arith.addf %109, %110 : vector<16x32xf32>
    %c0_49 = arith.constant 0 : index
    %c0_50 = arith.constant 0 : index
    %c0_51 = arith.constant 0 : index
    %112 = vector.load %arg9[%c0_49, %c0_50, %c0_51] : memref<2x32x64xf32, #tpu.memory_space<vmem>>, vector<1x32x64xf32>
    %113 = vector.shape_cast %112 : vector<1x32x64xf32> to vector<32x64xf32>
    %cst_52 = arith.constant dense<0.000000e+00> : vector<16x64xf32>
    %114 = tpu.matmul %111, %113, %cst_52 {dimension_numbers = #tpu.dot_dimension_numbers<[1], [0], [0], [1], [0, 0, 1, 1], [], []>} : vector<16x32xf32>, vector<32x64xf32>, vector<16x64xf32> -> vector<16x64xf32>
    %c0_53 = arith.constant 0 : index
    %c0_54 = arith.constant 0 : index
    %c0_55 = arith.constant 0 : index
    %115 = vector.load %arg10[%c0_53, %c0_54, %c0_55] : memref<2x1x64xf32, #tpu.memory_space<vmem>>, vector<1x1x64xf32>
    %116 = vector.shape_cast %115 : vector<1x1x64xf32> to vector<1x64xf32>
    %117 = vector.broadcast %116 : vector<1x64xf32> to vector<16x64xf32>
    %118 = arith.addf %114, %117 : vector<16x64xf32>
    %119 = arith.mulf %118, %118 : vector<16x64xf32>
    %120 = arith.mulf %118, %119 : vector<16x64xf32>
    %cst_56 = arith.constant 4.471500e-02 : f32
    %121 = vector.broadcast %cst_56 : f32 to vector<16x64xf32>
    %122 = arith.mulf %121, %120 : vector<16x64xf32>
    %123 = arith.addf %118, %122 : vector<16x64xf32>
    %cst_57 = arith.constant 0.797884583 : f32
    %124 = vector.broadcast %cst_57 : f32 to vector<16x64xf32>
    %125 = arith.mulf %124, %123 : vector<16x64xf32>
    %126 = math.tanh %125 : vector<16x64xf32>
    %cst_58 = arith.constant 1.000000e+00 : f32
    %127 = vector.broadcast %cst_58 : f32 to vector<16x64xf32>
    %128 = arith.addf %127, %126 : vector<16x64xf32>
    %cst_59 = arith.constant 5.000000e-01 : f32
    %129 = vector.broadcast %cst_59 : f32 to vector<16x64xf32>
    %130 = arith.mulf %129, %128 : vector<16x64xf32>
    %131 = arith.mulf %118, %130 : vector<16x64xf32>
    %c0_60 = arith.constant 0 : index
    %c0_61 = arith.constant 0 : index
    %c0_62 = arith.constant 0 : index
    %132 = vector.load %arg11[%c0_60, %c0_61, %c0_62] : memref<2x64x32xf32, #tpu.memory_space<vmem>>, vector<1x64x32xf32>
    %133 = vector.shape_cast %132 : vector<1x64x32xf32> to vector<64x32xf32>
    %cst_63 = arith.constant dense<0.000000e+00> : vector<16x32xf32>
    %134 = tpu.matmul %131, %133, %cst_63 {dimension_numbers = #tpu.dot_dimension_numbers<[1], [0], [0], [1], [0, 0, 1, 1], [], []>} : vector<16x64xf32>, vector<64x32xf32>, vector<16x32xf32> -> vector<16x32xf32>
    %c0_64 = arith.constant 0 : index
    %c0_65 = arith.constant 0 : index
    %c0_66 = arith.constant 0 : index
    %135 = vector.load %arg12[%c0_64, %c0_65, %c0_66] : memref<2x1x32xf32, #tpu.memory_space<vmem>>, vector<1x1x32xf32>
    %136 = vector.shape_cast %135 : vector<1x1x32xf32> to vector<1x32xf32>
    %137 = vector.broadcast %136 : vector<1x32xf32> to vector<16x32xf32>
    %138 = arith.addf %134, %137 : vector<16x32xf32>
    %139 = arith.addf %111, %138 : vector<16x32xf32>
    %c0_67 = arith.constant 0 : index
    %c0_68 = arith.constant 0 : index
    %c0_69 = arith.constant 0 : index
    %140 = vector.load %arg13[%c0_67, %c0_68, %c0_69] : memref<2x1x32xf32, #tpu.memory_space<vmem>>, vector<1x1x32xf32>
    %141 = vector.shape_cast %140 : vector<1x1x32xf32> to vector<1x32xf32>
    %c0_70 = arith.constant 0 : index
    %c0_71 = arith.constant 0 : index
    %c0_72 = arith.constant 0 : index
    %142 = vector.load %arg14[%c0_70, %c0_71, %c0_72] : memref<2x1x32xf32, #tpu.memory_space<vmem>>, vector<1x1x32xf32>
    %143 = vector.shape_cast %142 : vector<1x1x32xf32> to vector<1x32xf32>
    %cst_73 = arith.constant dense<0.000000e+00> : vector<16xf32>
    %144 = vector.multi_reduction <add>, %139, %cst_73 [1] : vector<16x32xf32> to vector<16xf32>
    %145 = vector.shape_cast %144 : vector<16xf32> to vector<16x1xf32>
    %cst_74 = arith.constant 3.200000e+01 : f32
    %146 = vector.broadcast %cst_74 : f32 to vector<16x1xf32>
    %147 = arith.divf %145, %146 : vector<16x1xf32>
    %148 = vector.broadcast %147 : vector<16x1xf32> to vector<16x32xf32>
    %149 = arith.subf %139, %148 : vector<16x32xf32>
    %150 = arith.mulf %149, %149 : vector<16x32xf32>
    %cst_75 = arith.constant dense<0.000000e+00> : vector<16xf32>
    %151 = vector.multi_reduction <add>, %150, %cst_75 [1] : vector<16x32xf32> to vector<16xf32>
    %152 = vector.shape_cast %151 : vector<16xf32> to vector<16x1xf32>
    %cst_76 = arith.constant 3.200000e+01 : f32
    %153 = vector.broadcast %cst_76 : f32 to vector<16x1xf32>
    %154 = arith.divf %152, %153 : vector<16x1xf32>
    %155 = vector.broadcast %147 : vector<16x1xf32> to vector<16x32xf32>
    %156 = arith.subf %139, %155 : vector<16x32xf32>
    %cst_77 = arith.constant 9.99999996E-13 : f32
    %157 = vector.broadcast %cst_77 : f32 to vector<16x1xf32>
    %158 = arith.addf %154, %157 : vector<16x1xf32>
    %159 = math.rsqrt %158 : vector<16x1xf32>
    %160 = vector.broadcast %159 : vector<16x1xf32> to vector<16x32xf32>
    %161 = arith.mulf %156, %160 : vector<16x32xf32>
    %162 = vector.broadcast %141 : vector<1x32xf32> to vector<16x32xf32>
    %163 = arith.mulf %161, %162 : vector<16x32xf32>
    %164 = vector.broadcast %143 : vector<1x32xf32> to vector<16x32xf32>
    %165 = arith.addf %163, %164 : vector<16x32xf32>
    %c1_78 = arith.constant 1 : index
    %c0_79 = arith.constant 0 : index
    %c0_80 = arith.constant 0 : index
    %166 = vector.load %arg3[%c1_78, %c0_79, %c0_80] : memref<2x32x96xf32, #tpu.memory_space<vmem>>, vector<1x32x96xf32>
    %167 = vector.shape_cast %166 : vector<1x32x96xf32> to vector<32x96xf32>
    %cst_81 = arith.constant dense<0.000000e+00> : vector<16x96xf32>
    %168 = tpu.matmul %165, %167, %cst_81 {dimension_numbers = #tpu.dot_dimension_numbers<[1], [0], [0], [1], [0, 0, 1, 1], [], []>} : vector<16x32xf32>, vector<32x96xf32>, vector<16x96xf32> -> vector<16x96xf32>
    %c1_82 = arith.constant 1 : index
    %c0_83 = arith.constant 0 : index
    %c0_84 = arith.constant 0 : index
    %169 = vector.load %arg4[%c1_82, %c0_83, %c0_84] : memref<2x1x96xf32, #tpu.memory_space<vmem>>, vector<1x1x96xf32>
    %170 = vector.shape_cast %169 : vector<1x1x96xf32> to vector<1x96xf32>
    %171 = vector.broadcast %170 : vector<1x96xf32> to vector<16x96xf32>
    %172 = arith.addf %168, %171 : vector<16x96xf32>
    %c1_85 = arith.constant 1 : index
    %c0_86 = arith.constant 0 : index
    %c0_87 = arith.constant 0 : index
    %173 = vector.load %arg6[%c1_85, %c0_86, %c0_87] : memref<2x1x32xf32, #tpu.memory_space<vmem>>, vector<1x1x32xf32>
    %174 = vector.shape_cast %173 : vector<1x1x32xf32> to vector<1x32xf32>
    %175 = vector.extract_strided_slice %172 {offsets = [0, 0], sizes = [16, 16], strides = [1, 1]} : vector<16x96xf32> to vector<16x16xf32>
    %176 = vector.shape_cast %175 : vector<16x16xf32> to vector<2x8x16xf32>
    %177 = vector.extract_strided_slice %172 {offsets = [0, 32], sizes = [16, 16], strides = [1, 1]} : vector<16x96xf32> to vector<16x16xf32>
    %178 = vector.shape_cast %177 : vector<16x16xf32> to vector<2x8x16xf32>
    %179 = vector.extract_strided_slice %172 {offsets = [0, 64], sizes = [16, 16], strides = [1, 1]} : vector<16x96xf32> to vector<16x16xf32>
    %180 = vector.shape_cast %179 : vector<16x16xf32> to vector<2x8x16xf32>
    "tpu.trace_start"() <{level = 10 : i32, message = "bqd,bkd->bqk"}> : () -> ()
    %cst_88 = arith.constant dense<0.000000e+00> : vector<2x8x8xf32>
    %181 = tpu.matmul %176, %178, %cst_88 {dimension_numbers = #tpu.dot_dimension_numbers<[2], [2], [1], [1], [0, 0, 0, 1, 1, 1], [0], [0]>} : vector<2x8x16xf32>, vector<2x8x16xf32>, vector<2x8x8xf32> -> vector<2x8x8xf32>
    "tpu.trace_stop"() : () -> ()
    %cst_89 = arith.constant 2.500000e-01 : f32
    %182 = vector.broadcast %cst_89 : f32 to vector<2x8x8xf32>
    %183 = arith.mulf %181, %182 : vector<2x8x8xf32>
    %cst_90 = arith.constant dense<0xFF800000> : vector<2x8xf32>
    %184 = vector.multi_reduction <maximumf>, %183, %cst_90 [2] : vector<2x8x8xf32> to vector<2x8xf32>
    %185 = vector.shape_cast %184 : vector<2x8xf32> to vector<2x8x1xf32>
    %186 = vector.broadcast %185 : vector<2x8x1xf32> to vector<2x8x8xf32>
    %187 = arith.subf %183, %186 : vector<2x8x8xf32>
    %188 = math.exp %187 : vector<2x8x8xf32>
    %cst_91 = arith.constant dense<0.000000e+00> : vector<2x8xf32>
    %189 = vector.multi_reduction <add>, %188, %cst_91 [2] : vector<2x8x8xf32> to vector<2x8xf32>
    %190 = vector.shape_cast %189 : vector<2x8xf32> to vector<2x8x1xf32>
    %191 = tpu.reciprocal %190 {approx = true} : vector<2x8x1xf32> -> vector<2x8x1xf32>
    %192 = vector.broadcast %191 : vector<2x8x1xf32> to vector<2x8x8xf32>
    %193 = arith.mulf %188, %192 : vector<2x8x8xf32>
    "tpu.trace_start"() <{level = 10 : i32, message = "bqk,bkd->bqd"}> : () -> ()
    %cst_92 = arith.constant dense<0.000000e+00> : vector<2x8x16xf32>
    %194 = tpu.matmul %193, %180, %cst_92 {dimension_numbers = #tpu.dot_dimension_numbers<[2], [1], [1], [2], [0, 0, 0, 1, 1, 2], [0], [0]>} : vector<2x8x8xf32>, vector<2x8x16xf32>, vector<2x8x16xf32> -> vector<2x8x16xf32>
    "tpu.trace_stop"() : () -> ()
    %195 = vector.shape_cast %194 : vector<2x8x16xf32> to vector<16x16xf32>
    %c1_93 = arith.constant 1 : index
    %c0_94 = arith.constant 0 : index
    %c0_95 = arith.constant 0 : index
    %c0_96 = arith.constant 0 : index
    %196 = vector.load %arg5[%c1_93, %c0_94, %c0_95, %c0_96] : memref<2x2x16x32xf32, #tpu.memory_space<vmem>>, vector<1x1x16x32xf32>
    %197 = vector.shape_cast %196 : vector<1x1x16x32xf32> to vector<16x32xf32>
    %cst_97 = arith.constant dense<0.000000e+00> : vector<16x32xf32>
    %198 = tpu.matmul %195, %197, %cst_97 {dimension_numbers = #tpu.dot_dimension_numbers<[1], [0], [0], [1], [0, 0, 1, 1], [], []>} : vector<16x16xf32>, vector<16x32xf32>, vector<16x32xf32> -> vector<16x32xf32>
    %199 = vector.broadcast %174 : vector<1x32xf32> to vector<16x32xf32>
    %200 = arith.addf %199, %198 : vector<16x32xf32>
    %201 = vector.extract_strided_slice %172 {offsets = [0, 16], sizes = [16, 16], strides = [1, 1]} : vector<16x96xf32> to vector<16x16xf32>
    %202 = vector.shape_cast %201 : vector<16x16xf32> to vector<2x8x16xf32>
    %203 = vector.extract_strided_slice %172 {offsets = [0, 48], sizes = [16, 16], strides = [1, 1]} : vector<16x96xf32> to vector<16x16xf32>
    %204 = vector.shape_cast %203 : vector<16x16xf32> to vector<2x8x16xf32>
    %205 = vector.extract_strided_slice %172 {offsets = [0, 80], sizes = [16, 16], strides = [1, 1]} : vector<16x96xf32> to vector<16x16xf32>
    %206 = vector.shape_cast %205 : vector<16x16xf32> to vector<2x8x16xf32>
    "tpu.trace_start"() <{level = 10 : i32, message = "bqd,bkd->bqk"}> : () -> ()
    %cst_98 = arith.constant dense<0.000000e+00> : vector<2x8x8xf32>
    %207 = tpu.matmul %202, %204, %cst_98 {dimension_numbers = #tpu.dot_dimension_numbers<[2], [2], [1], [1], [0, 0, 0, 1, 1, 1], [0], [0]>} : vector<2x8x16xf32>, vector<2x8x16xf32>, vector<2x8x8xf32> -> vector<2x8x8xf32>
    "tpu.trace_stop"() : () -> ()
    %cst_99 = arith.constant 2.500000e-01 : f32
    %208 = vector.broadcast %cst_99 : f32 to vector<2x8x8xf32>
    %209 = arith.mulf %207, %208 : vector<2x8x8xf32>
    %cst_100 = arith.constant dense<0xFF800000> : vector<2x8xf32>
    %210 = vector.multi_reduction <maximumf>, %209, %cst_100 [2] : vector<2x8x8xf32> to vector<2x8xf32>
    %211 = vector.shape_cast %210 : vector<2x8xf32> to vector<2x8x1xf32>
    %212 = vector.broadcast %211 : vector<2x8x1xf32> to vector<2x8x8xf32>
    %213 = arith.subf %209, %212 : vector<2x8x8xf32>
    %214 = math.exp %213 : vector<2x8x8xf32>
    %cst_101 = arith.constant dense<0.000000e+00> : vector<2x8xf32>
    %215 = vector.multi_reduction <add>, %214, %cst_101 [2] : vector<2x8x8xf32> to vector<2x8xf32>
    %216 = vector.shape_cast %215 : vector<2x8xf32> to vector<2x8x1xf32>
    %217 = tpu.reciprocal %216 {approx = true} : vector<2x8x1xf32> -> vector<2x8x1xf32>
    %218 = vector.broadcast %217 : vector<2x8x1xf32> to vector<2x8x8xf32>
    %219 = arith.mulf %214, %218 : vector<2x8x8xf32>
    "tpu.trace_start"() <{level = 10 : i32, message = "bqk,bkd->bqd"}> : () -> ()
    %cst_102 = arith.constant dense<0.000000e+00> : vector<2x8x16xf32>
    %220 = tpu.matmul %219, %206, %cst_102 {dimension_numbers = #tpu.dot_dimension_numbers<[2], [1], [1], [2], [0, 0, 0, 1, 1, 2], [0], [0]>} : vector<2x8x8xf32>, vector<2x8x16xf32>, vector<2x8x16xf32> -> vector<2x8x16xf32>
    "tpu.trace_stop"() : () -> ()
    %221 = vector.shape_cast %220 : vector<2x8x16xf32> to vector<16x16xf32>
    %c1_103 = arith.constant 1 : index
    %c1_104 = arith.constant 1 : index
    %c0_105 = arith.constant 0 : index
    %c0_106 = arith.constant 0 : index
    %222 = vector.load %arg5[%c1_103, %c1_104, %c0_105, %c0_106] : memref<2x2x16x32xf32, #tpu.memory_space<vmem>>, vector<1x1x16x32xf32>
    %223 = vector.shape_cast %222 : vector<1x1x16x32xf32> to vector<16x32xf32>
    %cst_107 = arith.constant dense<0.000000e+00> : vector<16x32xf32>
    %224 = tpu.matmul %221, %223, %cst_107 {dimension_numbers = #tpu.dot_dimension_numbers<[1], [0], [0], [1], [0, 0, 1, 1], [], []>} : vector<16x16xf32>, vector<16x32xf32>, vector<16x32xf32> -> vector<16x32xf32>
    %225 = arith.addf %200, %224 : vector<16x32xf32>
    %226 = arith.addf %165, %225 : vector<16x32xf32>
    %c1_108 = arith.constant 1 : index
    %c0_109 = arith.constant 0 : index
    %c0_110 = arith.constant 0 : index
    %227 = vector.load %arg7[%c1_108, %c0_109, %c0_110] : memref<2x1x32xf32, #tpu.memory_space<vmem>>, vector<1x1x32xf32>
    %228 = vector.shape_cast %227 : vector<1x1x32xf32> to vector<1x32xf32>
    %c1_111 = arith.constant 1 : index
    %c0_112 = arith.constant 0 : index
    %c0_113 = arith.constant 0 : index
    %229 = vector.load %arg8[%c1_111, %c0_112, %c0_113] : memref<2x1x32xf32, #tpu.memory_space<vmem>>, vector<1x1x32xf32>
    %230 = vector.shape_cast %229 : vector<1x1x32xf32> to vector<1x32xf32>
    %cst_114 = arith.constant dense<0.000000e+00> : vector<16xf32>
    %231 = vector.multi_reduction <add>, %226, %cst_114 [1] : vector<16x32xf32> to vector<16xf32>
    %232 = vector.shape_cast %231 : vector<16xf32> to vector<16x1xf32>
    %cst_115 = arith.constant 3.200000e+01 : f32
    %233 = vector.broadcast %cst_115 : f32 to vector<16x1xf32>
    %234 = arith.divf %232, %233 : vector<16x1xf32>
    %235 = vector.broadcast %234 : vector<16x1xf32> to vector<16x32xf32>
    %236 = arith.subf %226, %235 : vector<16x32xf32>
    %237 = arith.mulf %236, %236 : vector<16x32xf32>
    %cst_116 = arith.constant dense<0.000000e+00> : vector<16xf32>
    %238 = vector.multi_reduction <add>, %237, %cst_116 [1] : vector<16x32xf32> to vector<16xf32>
    %239 = vector.shape_cast %238 : vector<16xf32> to vector<16x1xf32>
    %cst_117 = arith.constant 3.200000e+01 : f32
    %240 = vector.broadcast %cst_117 : f32 to vector<16x1xf32>
    %241 = arith.divf %239, %240 : vector<16x1xf32>
    %242 = vector.broadcast %234 : vector<16x1xf32> to vector<16x32xf32>
    %243 = arith.subf %226, %242 : vector<16x32xf32>
    %cst_118 = arith.constant 9.99999996E-13 : f32
    %244 = vector.broadcast %cst_118 : f32 to vector<16x1xf32>
    %245 = arith.addf %241, %244 : vector<16x1xf32>
    %246 = math.rsqrt %245 : vector<16x1xf32>
    %247 = vector.broadcast %246 : vector<16x1xf32> to vector<16x32xf32>
    %248 = arith.mulf %243, %247 : vector<16x32xf32>
    %249 = vector.broadcast %228 : vector<1x32xf32> to vector<16x32xf32>
    %250 = arith.mulf %248, %249 : vector<16x32xf32>
    %251 = vector.broadcast %230 : vector<1x32xf32> to vector<16x32xf32>
    %252 = arith.addf %250, %251 : vector<16x32xf32>
    %c1_119 = arith.constant 1 : index
    %c0_120 = arith.constant 0 : index
    %c0_121 = arith.constant 0 : index
    %253 = vector.load %arg9[%c1_119, %c0_120, %c0_121] : memref<2x32x64xf32, #tpu.memory_space<vmem>>, vector<1x32x64xf32>
    %254 = vector.shape_cast %253 : vector<1x32x64xf32> to vector<32x64xf32>
    %cst_122 = arith.constant dense<0.000000e+00> : vector<16x64xf32>
    %255 = tpu.matmul %252, %254, %cst_122 {dimension_numbers = #tpu.dot_dimension_numbers<[1], [0], [0], [1], [0, 0, 1, 1], [], []>} : vector<16x32xf32>, vector<32x64xf32>, vector<16x64xf32> -> vector<16x64xf32>
    %c1_123 = arith.constant 1 : index
    %c0_124 = arith.constant 0 : index
    %c0_125 = arith.constant 0 : index
    %256 = vector.load %arg10[%c1_123, %c0_124, %c0_125] : memref<2x1x64xf32, #tpu.memory_space<vmem>>, vector<1x1x64xf32>
    %257 = vector.shape_cast %256 : vector<1x1x64xf32> to vector<1x64xf32>
    %258 = vector.broadcast %257 : vector<1x64xf32> to vector<16x64xf32>
    %259 = arith.addf %255, %258 : vector<16x64xf32>
    %260 = arith.mulf %259, %259 : vector<16x64xf32>
    %261 = arith.mulf %259, %260 : vector<16x64xf32>
    %cst_126 = arith.constant 4.471500e-02 : f32
    %262 = vector.broadcast %cst_126 : f32 to vector<16x64xf32>
    %263 = arith.mulf %262, %261 : vector<16x64xf32>
    %264 = arith.addf %259, %263 : vector<16x64xf32>
    %cst_127 = arith.constant 0.797884583 : f32
    %265 = vector.broadcast %cst_127 : f32 to vector<16x64xf32>
    %266 = arith.mulf %265, %264 : vector<16x64xf32>
    %267 = math.tanh %266 : vector<16x64xf32>
    %cst_128 = arith.constant 1.000000e+00 : f32
    %268 = vector.broadcast %cst_128 : f32 to vector<16x64xf32>
    %269 = arith.addf %268, %267 : vector<16x64xf32>
    %cst_129 = arith.constant 5.000000e-01 : f32
    %270 = vector.broadcast %cst_129 : f32 to vector<16x64xf32>
    %271 = arith.mulf %270, %269 : vector<16x64xf32>
    %272 = arith.mulf %259, %271 : vector<16x64xf32>
    %c1_130 = arith.constant 1 : index
    %c0_131 = arith.constant 0 : index
    %c0_132 = arith.constant 0 : index
    %273 = vector.load %arg11[%c1_130, %c0_131, %c0_132] : memref<2x64x32xf32, #tpu.memory_space<vmem>>, vector<1x64x32xf32>
    %274 = vector.shape_cast %273 : vector<1x64x32xf32> to vector<64x32xf32>
    %cst_133 = arith.constant dense<0.000000e+00> : vector<16x32xf32>
    %275 = tpu.matmul %272, %274, %cst_133 {dimension_numbers = #tpu.dot_dimension_numbers<[1], [0], [0], [1], [0, 0, 1, 1], [], []>} : vector<16x64xf32>, vector<64x32xf32>, vector<16x32xf32> -> vector<16x32xf32>
    %c1_134 = arith.constant 1 : index
    %c0_135 = arith.constant 0 : index
    %c0_136 = arith.constant 0 : index
    %276 = vector.load %arg12[%c1_134, %c0_135, %c0_136] : memref<2x1x32xf32, #tpu.memory_space<vmem>>, vector<1x1x32xf32>
    %277 = vector.shape_cast %276 : vector<1x1x32xf32> to vector<1x32xf32>
    %278 = vector.broadcast %277 : vector<1x32xf32> to vector<16x32xf32>
    %279 = arith.addf %275, %278 : vector<16x32xf32>
    %280 = arith.addf %252, %279 : vector<16x32xf32>
    %c1_137 = arith.constant 1 : index
    %c0_138 = arith.constant 0 : index
    %c0_139 = arith.constant 0 : index
    %281 = vector.load %arg13[%c1_137, %c0_138, %c0_139] : memref<2x1x32xf32, #tpu.memory_space<vmem>>, vector<1x1x32xf32>
    %282 = vector.shape_cast %281 : vector<1x1x32xf32> to vector<1x32xf32>
    %c1_140 = arith.constant 1 : index
    %c0_141 = arith.constant 0 : index
    %c0_142 = arith.constant 0 : index
    %283 = vector.load %arg14[%c1_140, %c0_141, %c0_142] : memref<2x1x32xf32, #tpu.memory_space<vmem>>, vector<1x1x32xf32>
    %284 = vector.shape_cast %283 : vector<1x1x32xf32> to vector<1x32xf32>
    %cst_143 = arith.constant dense<0.000000e+00> : vector<16xf32>
    %285 = vector.multi_reduction <add>, %280, %cst_143 [1] : vector<16x32xf32> to vector<16xf32>
    %286 = vector.shape_cast %285 : vector<16xf32> to vector<16x1xf32>
    %cst_144 = arith.constant 3.200000e+01 : f32
    %287 = vector.broadcast %cst_144 : f32 to vector<16x1xf32>
    %288 = arith.divf %286, %287 : vector<16x1xf32>
    %289 = vector.broadcast %288 : vector<16x1xf32> to vector<16x32xf32>
    %290 = arith.subf %280, %289 : vector<16x32xf32>
    %291 = arith.mulf %290, %290 : vector<16x32xf32>
    %cst_145 = arith.constant dense<0.000000e+00> : vector<16xf32>
    %292 = vector.multi_reduction <add>, %291, %cst_145 [1] : vector<16x32xf32> to vector<16xf32>
    %293 = vector.shape_cast %292 : vector<16xf32> to vector<16x1xf32>
    %cst_146 = arith.constant 3.200000e+01 : f32
    %294 = vector.broadcast %cst_146 : f32 to vector<16x1xf32>
    %295 = arith.divf %293, %294 : vector<16x1xf32>
    %296 = vector.broadcast %288 : vector<16x1xf32> to vector<16x32xf32>
    %297 = arith.subf %280, %296 : vector<16x32xf32>
    %cst_147 = arith.constant 9.99999996E-13 : f32
    %298 = vector.broadcast %cst_147 : f32 to vector<16x1xf32>
    %299 = arith.addf %295, %298 : vector<16x1xf32>
    %300 = math.rsqrt %299 : vector<16x1xf32>
    %301 = vector.broadcast %300 : vector<16x1xf32> to vector<16x32xf32>
    %302 = arith.mulf %297, %301 : vector<16x32xf32>
    %303 = vector.broadcast %282 : vector<1x32xf32> to vector<16x32xf32>
    %304 = arith.mulf %302, %303 : vector<16x32xf32>
    %305 = vector.broadcast %284 : vector<1x32xf32> to vector<16x32xf32>
    %306 = arith.addf %304, %305 : vector<16x32xf32>
    %307 = vector.shape_cast %306 : vector<16x32xf32> to vector<2x8x32xf32>
    %c0_148 = arith.constant 0 : index
    %c0_149 = arith.constant 0 : index
    %c0_150 = arith.constant 0 : index
    %308 = vector.load %arg17[%c0_148, %c0_149, %c0_150] : memref<2x8x32xf32, #tpu.memory_space<vmem>>, vector<2x8x32xf32>
    tpu.vector_store %arg17[%c0_148, %c0_149, %c0_150], %307 {strides = array<i32>} : memref<2x8x32xf32, #tpu.memory_space<vmem>>, vector<2x8x32xf32>,
    %309 = vector.extract_strided_slice %307 {offsets = [0, 0, 0], sizes = [2, 1, 32], strides = [1, 1, 1]} : vector<2x8x32xf32> to vector<2x1x32xf32>
    %310 = vector.shape_cast %309 : vector<2x1x32xf32> to vector<2x32xf32>
    %c0_151 = arith.constant 0 : index
    %c0_152 = arith.constant 0 : index
    %311 = vector.load %arg15[%c0_151, %c0_152] : memref<32x32xf32, #tpu.memory_space<vmem>>, vector<32x32xf32>
    %cst_153 = arith.constant dense<0.000000e+00> : vector<2x32xf32>
    %312 = tpu.matmul %310, %311, %cst_153 {dimension_numbers = #tpu.dot_dimension_numbers<[1], [0], [0], [1], [0, 0, 1, 1], [], []>} : vector<2x32xf32>, vector<32x32xf32>, vector<2x32xf32> -> vector<2x32xf32>
    %c0_154 = arith.constant 0 : index
    %c0_155 = arith.constant 0 : index
    %313 = vector.load %arg16[%c0_154, %c0_155] : memref<1x32xf32, #tpu.memory_space<vmem>>, vector<1x32xf32>
    %314 = vector.broadcast %313 : vector<1x32xf32> to vector<2x32xf32>
    %315 = arith.addf %312, %314 : vector<2x32xf32>
    %316 = math.tanh %315 : vector<2x32xf32>
    %c0_156 = arith.constant 0 : index
    %c0_157 = arith.constant 0 : index
    %317 = vector.load %arg18[%c0_156, %c0_157] : memref<2x32xf32, #tpu.memory_space<vmem>>, vector<2x32xf32>
    tpu.vector_store %arg18[%c0_156, %c0_157], %316 {strides = array<i32>} : memref<2x32xf32, #tpu.memory_space<vmem>>, vector<2x32xf32>,
    return
  }
}

</mosaic_0001>

<bundles_post_ra>
// kernel: bert_model_forward.1
= control target key start
LH: loop header
LB: loop body
LE: loop exit
PB: predicated region body
PF: predicated region fallthrough
CT: control target
= control target key end

     0   :  { %s3841_s0 = inlined_call_operand.vmem [shape: f32[16,32], index: 0, kind: input, shape index: {}]   ;;  %s3842_s1 = inlined_call_operand.vmem [shape: f32[1,32], index: 1, kind: input, shape index: {}]   ;;  %s3843_s2 = inlined_call_operand.vmem [shape: f32[1,32], index: 2, kind: input, shape index: {}]   ;;  %s3844_s3 = inlined_call_operand.vmem [shape: f32[2,32,96], index: 3, kind: input, shape index: {}]   ;;  %s3845_s4 = inlined_call_operand.vmem [shape: f32[2,1,96], index: 4, kind: input, shape index: {}]   ;;  %s3846_s5 = inlined_call_operand.vmem [shape: f32[2,2,16,32], index: 5, kind: input, shape index: {}]   ;;  %s3847_s6 = inlined_call_operand.vmem [shape: f32[2,1,32], index: 6, kind: input, shape index: {}]   ;;  %s3848_s7 = inlined_call_operand.vmem [shape: f32[2,1,32], index: 7, kind: input, shape index: {}]   ;;  %s3849_s8 = inlined_call_operand.vmem [shape: f32[2,1,32], index: 8, kind: input, shape index: {}]   ;;  %s3850_s9 = inlined_call_operand.vmem [shape: f32[2,32,64], index: 9, kind: input, shape index: {}]   ;;  %s3851_s10 = inlined_call_operand.vmem [shape: f32[2,1,64], index: 10, kind: input, shape index: {}]   ;;  %s3852_s11 = inlined_call_operand.vmem [shape: f32[2,64,32], index: 11, kind: input, shape index: {}]   ;;  %s3853_s12 = inlined_call_operand.vmem [shape: f32[2,1,32], index: 12, kind: input, shape index: {}]   ;;  %s3854_s13 = inlined_call_operand.vmem [shape: f32[2,1,32], index: 13, kind: input, shape index: {}]   ;;  %s3855_s14 = inlined_call_operand.vmem [shape: f32[2,1,32], index: 14, kind: input, shape index: {}]   ;;  %s3856_s15 = inlined_call_operand.vmem [shape: f32[32,32], index: 15, kind: input, shape index: {}]   ;;  %s3857_s16 = inlined_call_operand.vmem [shape: f32[1,32], index: 16, kind: input, shape index: {}]   ;;  %s3858_s17 = inlined_call_operand.hbm [shape: f32[2,8,32], index: 17, kind: output, shape index: {0}]   ;;  %s3859_s18 = inlined_call_operand.hbm [shape: f32[2,32], index: 18, kind: output, shape index: {1}]  }
   0x1   :  { %3861 = sst [smem:[#allocation8_spill]] %s3841_s0 }
   0x2   :  { %3862 = sst [smem:[#allocation9_spill]] %s3842_s1 }
   0x3   :  { %3863 = sst [smem:[#allocation10_spill]] %s3843_s2 }
   0x4   :  { %24 = vsyncpa [#allocation3], 0  ;;  %s3864_s29 = sld [smem:[#allocation8_spill]]  ;;  %vm64_vm0 = vcmask 261120  }
   0xa   :  { %v60_v0 = vld [vmem:[%s3864_s29] sm:$0xff]  ;;  %v61_v1 = vld [vmem:[%s3864_s29 + $0x8] sm:$0xff] }
   0xb   :  { %25 = vsyncpa [#allocation5], 0  ;;  %v65_v2 = vsel %vm64_vm0, %v60_v0, 0.0  ;;  %v68_v3 = vsel %vm64_vm0, %v61_v1, 0.0  ;;  %v108_v14 = vld [vmem:[%s3844_s3] sm:$0xff]  ;;  %v109_v15 = vld [vmem:[%s3844_s3 + $0x8] sm:$0xff] }
   0xc   :  { %66 = vadd.xlane.f32.xlu0 %v65_v2  ;;  %v110_v16 = vld [vmem:[%s3844_s3 + $0x10] sm:$0xff]  ;;  %v3098_v17 = vpack.c.bf16 %v109_v15, %v108_v14  ;;  %v111_v18 = vld [vmem:[%s3844_s3 + $0x18] sm:$0xff]  ;;  %s3865_s27 = sld [smem:[#allocation9_spill]]  ;;  %s3866_s30 = sld [smem:[#allocation10_spill]]  ;;  %v3314_v36 = vmov 0.0   ;;  %vm3315_vm1 = vmmov 0  }
   0xd   :  { %v3102_v19 = vpack.c.bf16 %v111_v18, %v110_v16  ;;  %2908 = vmatprep.subr.mxu1 %v3314_v36  ;;  %2910 = vmatprep.mubr.msk.f32.mxu1 %vm3315_vm1, %v3314_v36  ;;  %v2708_v37 = vld [vmem:[%s3845_s4] ss:$0 sm:$0xff]  ;;  %s3316_s1 = smov 96   ;;  %vm204_vm2 = vcmask 130048   ;;  %vm358_vm3 = vcmask 64512   ;;  %s3317_s20 = smov 64  }
   0xe   :  { %3099 = vmatprep.subr.bf16.mxu0 %v3098_v17  ;;  %s3318_s21 = smov 80   ;;  %s3319_s22 = smov 112   ;;  %v533_v62 = vld [vmem:[%s3846_s5] sm:$0xff]  ;;  %v534_v63 = vld [vmem:[%s3846_s5 + $0x8] sm:$0xff]  ;;  %vm1213_vm4 = vcmask 523264   ;;  %vm2599_vm5 = vcmask 1041409  }
   0xf   :  { %3101 = vmatpush3.bf16.msra.mxu0 %v3098_v17  ;;  %s3320_s26 = smov 48  }
  0x10   :  { %69 = vadd.xlane.f32.xlu0 %v68_v3  ;;  %3103 = vmatprep.subr.bf16.mxu0 %v3102_v19 }
  0x12   :  { %v2706_v27 = vld [vmem:[%s3865_s27] ss:$0 sm:$0xff] }
  0x13   :  { %3105 = vmatpush3.bf16.msra.mxu0 %v3102_v19  ;;  %v2707_v29 = vld [vmem:[%s3866_s30] ss:$0 sm:$0xff] }
  0x99   :  { %v67_v4 = vpop.xlane.xlu0 %66 }
  0x9a   :  { %v72_v5 = vmul.f32 0.03125, %v67_v4 }
  0x9c   :  { %v74_v6 = vsub.f32 %v60_v0, %v72_v5  ;;  %v3106_v0 = vpack.c.bf16 %v534_v63, %v533_v62 }
  0x9d   :  { %v70_v7 = vpop.xlane.xlu0 %69 }
  0x9e   :  { %v73_v8 = vmul.f32 0.03125, %v70_v7  ;;  %v76_v9 = vmul.f32 %v74_v6, %v74_v6  ;;  %3107 = vmatprep.subr.bf16.mxu0 %v3106_v0 }
  0xa0   :  { %v75_v10 = vsub.f32 %v61_v1, %v73_v8  ;;  %v78_v11 = vsel %vm64_vm0, %v76_v9, 0.0 }
  0xa1   :  { %79 = vadd.xlane.f32.xlu1 %v78_v11 }
  0xa2   :  { %v77_v12 = vmul.f32 %v75_v10, %v75_v10 }
  0xa4   :  { %v81_v13 = vsel %vm64_vm0, %v77_v12, 0.0 }
  0xa5   :  { %82 = vadd.xlane.f32.xlu1 %v81_v13 }
 0x12e   :  { %v80_v20 = vpop.xlane.xlu1 %79 }
 0x12f   :  { %v84_v21 = vmul.f32 0.03125, %v80_v20 }
 0x131   :  { %v86_v22 = vadd.f32 1e-12, %v84_v21 }
 0x132   :  { %v83_v23 = vpop.xlane.xlu1 %82 }
 0x133   :  { %3204 = vrsqrt.f32 %v86_v22  ;;  %v85_v24 = vmul.f32 0.03125, %v83_v23 }
 0x135   :  { %v87_v25 = vadd.f32 1e-12, %v85_v24 }
 0x137   :  { %3206 = vrsqrt.f32 %v87_v25 }
 0x13d   :  { %v3205_v26 = vpop.eup %3204 }
 0x13e   :  { %v90_v28 = vmul.f32 %v3205_v26, %v74_v6 }
 0x140   :  { %v98_v30 = vmul.f32 %v2706_v27, %v90_v28 }
 0x141   :  { %v3207_v31 = vpop.eup %3206 }
 0x142   :  { %v91_v32 = vmul.f32 %v3207_v31, %v75_v10  ;;  %v3449_v33 = vadd.f32 %v2707_v29, %v98_v30 }
 0x144   :  { %v99_v34 = vmul.f32 %v2706_v27, %v91_v32  ;;  %2905 = vmatprep.mubr.msk.f32.mxu0 %vm64_vm0, %v3449_v33 }
 0x146   :  { %v3453_v35 = vadd.f32 %v2707_v29, %v99_v34 }
 0x148   :  { %2906 = vmatmul.mubr.msk.f32.vlgmr.msra.gmra.mrb[0].mxu0 %vm64_vm0, %v3453_v35 }
 0x149   :  { %3109 = vmatpush3.bf16.msra.mxu0 %v3106_v0 }
 0x14a   :  { %2940 = vmatprep.subr.mxu0 %v3314_v36 }
 0x21b   :  { %v2907_v38 = vpop.f32.mrb[0].mxu0 }
 0x21c   :  { %v3463_v39 = vadd.f32 %v2907_v38, %v2708_v37  ;;  %v191_v40 = vpop.f32.mrb[1].mxu0 }
 0x21d   :  { %v3465_v41 = vadd.f32 %v2708_v37, %v191_v40 }
 0x21e   :  { %280 = vrot.lane.b32.xlu1 %v3463_v39, %s3316_s1 }
 0x21f   :  { %202 = vrot.lane.b32.xlu0 %v3465_v41, %s3316_s1 }
 0x290   :  { %v281_v43 = vpop.permute.xlu1 %280 }
 0x291   :  { %v203_v42 = vpop.permute.xlu0 %202 }
 0x292   :  { %2909 = vmatpush3.xpose.msk.msra.mxu1 %vm204_vm2, %v203_v42 }
 0x293   :  { %2913 = vmatprep.subr.mxu1 %v3314_v36 }
 0x295   :  { %2911 = vmatmul.mubr.msk.f32.vlgmr.msra.gmra.mrb[0].mxu1 %vm204_vm2, %v3465_v41 }
 0x296   :  { %2914 = vmatpush3.xpose.msk.msra.mxu1 %vm204_vm2, %v281_v43  ;;  %2915 = vmatprep.mubr.msk.f32.mxu1 %vm3315_vm1, %v3314_v36 }
 0x297   :  { %2918 = vmatprep.subr.mxu1 %v3314_v36 }
 0x299   :  { %2916 = vmatmul.mubr.msk.f32.vlgmr.msra.gmra.mrb[2].mxu1 %vm204_vm2, %v3463_v39 }
 0x29a   :  { %2920 = vmatprep.mubr.msk.f32.mxu1 %vm3315_vm1, %v3314_v36 }
 0x368   :  { %v275_v44 = vpop.f32.mrb[0].mxu1 }
 0x369   :  { %v356_v45 = vmul.f32 0.25, %v275_v44  ;;  %v2912_v46 = vpop.f32.mrb[1].mxu1 }
 0x36b   :  { %v359_v47 = vsel %vm358_vm3, %v356_v45, -inf }
 0x36c   :  { %360 = vmax.xlane.f32.xlu1 %v359_v47  ;;  %v352_v48 = vpop.f32.mrb[2].mxu1  ;;  %v2726_v47 = vld [vmem:[%s3846_s5 + $0x10] sm:$0xff] }
 0x36d   :  { %v357_v49 = vmul.f32 0.25, %v352_v48  ;;  %v2917_v50 = vpop.f32.mrb[3].mxu1 }
 0x36f   :  { %v362_v51 = vsel %vm358_vm3, %v357_v49, -inf }
 0x370   :  { %363 = vmax.xlane.f32.xlu0 %v362_v51 }
 0x3f9   :  { %v361_v52 = vpop.xlane.xlu1 %360 }
 0x3fa   :  { %v365_v53 = vsub.f32 %v356_v45, %v361_v52 }
 0x3fc   :  { %v367_v54 = vmul.f32 1.442695, %v365_v53  ;;  %v2719_v53 = vld [vmem:[%s3847_s6] ss:$0 sm:$0xff] }
 0x3fd   :  { %v364_v55 = vpop.xlane.xlu0 %363 }
 0x3fe   :  { %3208 = vpow2.f32 %v367_v54  ;;  %v366_v56 = vsub.f32 %v357_v49, %v364_v55 }
 0x400   :  { %v369_v57 = vmul.f32 1.442695, %v366_v56 }
 0x402   :  { %3210 = vpow2.f32 %v369_v57 }
 0x408   :  { %v3209_v58 = vpop.eup %3208 }
 0x409   :  { %v371_v59 = vsel %vm358_vm3, %v3209_v58, 0.0 }
 0x40a   :  { %372 = vadd.xlane.f32.xlu0 %v371_v59 }
 0x40c   :  { %v3211_v60 = vpop.eup %3210 }
 0x40d   :  { %v374_v61 = vsel %vm358_vm3, %v3211_v60, 0.0 }
 0x40e   :  { %375 = vadd.xlane.f32.xlu1 %v374_v61 }
 0x41f   :  { %457 = vrot.lane.b32.xlu1 %v3463_v39, %s3317_s20 }
 0x420   :  { %381 = vrot.lane.b32.xlu0 %v3465_v41, %s3317_s20 }
 0x423   :  { %626 = vrot.lane.b32.xlu1 %v3465_v41, %s3318_s21 }
 0x424   :  { %624 = vrot.lane.b32.xlu0 %v3465_v41, %s3319_s22 }
 0x427   :  { %704 = vrot.lane.b32.xlu1 %v3463_v39, %s3318_s21 }
 0x42b   :  { %702 = vrot.lane.b32.xlu1 %v3463_v39, %s3319_s22 }
 0x497   :  { %v373_v1 = vpop.xlane.xlu0 %372 }
 0x498   :  { %3212 = vrcp.f32 %v373_v1 }
 0x49b   :  { %v376_v2 = vpop.xlane.xlu1 %375  ;;  %v382_v3 = vpop.permute.xlu0 %381 }
 0x49c   :  { %3214 = vrcp.f32 %v376_v2  ;;  %2919 = vmatpush3.msra.mxu1 %v382_v3 }
 0x49d   :  { %2923 = vmatprep.subr.mxu1 %v3314_v36 }
 0x49f   :  { %v458_v6 = vpop.permute.xlu1 %457  ;;  %v625_v10 = vpop.permute.xlu0 %624 }
 0x4a2   :  { %v3213_v4 = vpop.eup %3212 }
 0x4a3   :  { %v379_v5 = vmul.f32 %v3213_v4, %v3209_v58  ;;  %v627_v9 = vpop.permute.xlu1 %626 }
 0x4a5   :  { %2921 = vmatmul.mubr.msk.f32.vlgmr.msra.gmra.mrb[4].mxu1 %vm358_vm3, %v379_v5 }
 0x4a6   :  { %v3215_v7 = vpop.eup %3214  ;;  %2924 = vmatpush3.msra.mxu1 %v458_v6  ;;  %2925 = vmatprep.mubr.msk.f32.mxu1 %vm3315_vm1, %v3314_v36 }
 0x4a7   :  { %v380_v8 = vmul.f32 %v3215_v7, %v3211_v60  ;;  %2935 = vmatprep.subr.mxu1 %v3314_v36  ;;  %v705_v13 = vpop.permute.xlu1 %704  ;;  %v1089_v7 = vld [vmem:[%s3850_s9 + $0x8] sm:$0xff] }
 0x4a9   :  { %2926 = vmatmul.mubr.msk.f32.vlgmr.msra.gmra.mrb[6].mxu1 %vm358_vm3, %v380_v8 }
 0x4aa   :  { %2937 = vmatprep.mubr.msk.f32.mxu1 %vm3315_vm1, %v3314_v36 }
 0x4ab   :  { %v703_v16 = vpop.permute.xlu1 %702 }
 0x4ad   :  { %2936 = vmatpush3.xpose.msk.msra.mxu1 %vm204_vm2, %v627_v9  ;;  %v1090_v9 = vld [vmem:[%s3850_s9 + $0x10] sm:$0xff] }
 0x4ae   :  { %2945 = vmatprep.subr.mxu1 %v3314_v36 }
 0x4b0   :  { %2938 = vmatmul.mubr.msk.f32.vlgmr.msra.gmra.mrb[8].mxu1 %vm204_vm2, %v625_v10  ;;  %v1091_v10 = vld [vmem:[%s3850_s9 + $0x18] sm:$0xff] }
 0x4b1   :  { %2947 = vmatprep.mubr.msk.f32.mxu1 %vm3315_vm1, %v3314_v36 }
 0x578   :  { %v453_v11 = vpop.f32.mrb[4].mxu1 }
 0x579   :  { %v2922_v12 = vpop.f32.mrb[5].mxu1  ;;  %2932 = vmatprep.mubr.msk.f32.mxu0 %vm204_vm2, %v453_v11  ;;  %v3118_v11 = vpack.c.bf16 %v1091_v10, %v1090_v9 }
 0x57c   :  { %v529_v14 = vpop.f32.mrb[6].mxu1 }
 0x57d   :  { %v2927_v15 = vpop.f32.mrb[7].mxu1  ;;  %2933 = vmatmul.mubr.msk.f32.vlgmr.msra.gmra.mrb[2].mxu0 %vm204_vm2, %v529_v14 }
 0x57e   :  { %2941 = vmatpush3.xpose.msk.msra.mxu0 %vm204_vm2, %v705_v13  ;;  %2942 = vmatprep.mubr.msk.f32.mxu0 %vm3315_vm1, %v3314_v36 }
 0x57f   :  { %2950 = vmatprep.subr.mxu0 %v3314_v36 }
 0x581   :  { %2943 = vmatmul.mubr.msk.f32.vlgmr.msra.gmra.mrb[4].mxu0 %vm204_vm2, %v703_v16 }
 0x582   :  { %2952 = vmatprep.mubr.msk.f32.mxu0 %vm3315_vm1, %v3314_v36 }
 0x583   :  { %v698_v17 = vpop.f32.mrb[8].mxu1 }
 0x584   :  { %v780_v18 = vmul.f32 0.25, %v698_v17  ;;  %v2939_v19 = vpop.f32.mrb[9].mxu1 }
 0x585   :  { %v2730_v19 = vld [vmem:[%s3848_s7] ss:$0 sm:$0xff] }
 0x586   :  { %v782_v20 = vsel %vm358_vm3, %v780_v18, -inf }
 0x587   :  { %783 = vmax.xlane.f32.xlu0 %v782_v20 }
 0x614   :  { %v784_v21 = vpop.xlane.xlu0 %783 }
 0x615   :  { %v788_v22 = vsub.f32 %v780_v18, %v784_v21 }
 0x617   :  { %v790_v23 = vmul.f32 1.442695, %v788_v22 }
 0x619   :  { %3216 = vpow2.f32 %v790_v23  ;;  %v2731_v23 = vld [vmem:[%s3849_s8] ss:$0 sm:$0xff] }
 0x623   :  { %v3217_v24 = vpop.eup %3216 }
 0x624   :  { %v794_v25 = vsel %vm358_vm3, %v3217_v24, 0.0 }
 0x625   :  { %795 = vadd.xlane.f32.xlu0 %v794_v25 }
 0x654   :  { %v776_v26 = vpop.f32.mrb[4].mxu0 }
 0x655   :  { %v781_v27 = vmul.f32 0.25, %v776_v26  ;;  %v2944_v28 = vpop.f32.mrb[5].mxu0 }
 0x656   :  { %v1198_v28 = vld [vmem:[%s3852_s11] sm:$0xff] }
 0x657   :  { %v785_v29 = vsel %vm358_vm3, %v781_v27, -inf }
 0x658   :  { %786 = vmax.xlane.f32.xlu1 %v785_v29  ;;  %v1199_v29 = vld [vmem:[%s3852_s11 + $0x8] sm:$0xff] }
 0x669   :  { %880 = vrot.lane.b32.xlu1 %v3463_v39, %s3320_s26 }
 0x6b2   :  { %v796_v40 = vpop.xlane.xlu0 %795 }
 0x6e5   :  { %v787_v30 = vpop.xlane.xlu1 %786 }
 0x6e6   :  { %v789_v31 = vsub.f32 %v781_v27, %v787_v30  ;;  %v3122_v30 = vpack.c.bf16 %v1199_v29, %v1198_v28 }
 0x6e8   :  { %v792_v32 = vmul.f32 1.442695, %v789_v31  ;;  %v1200_v31 = vld [vmem:[%s3852_s11 + $0x10] sm:$0xff] }
 0x6e9   :  { %v881_v34 = vpop.permute.xlu1 %880 }
 0x6ea   :  { %3218 = vpow2.f32 %v792_v32  ;;  %2951 = vmatpush3.msra.mxu0 %v881_v34  ;;  %v1201_v32 = vld [vmem:[%s3852_s11 + $0x18] sm:$0xff] }
 0x6eb   :  { %3220 = vrcp.f32 %v796_v40  ;;  %v3126_v34 = vpack.c.bf16 %v1201_v32, %v1200_v31  ;;  %v2738_v32 = vld [vmem:[%s3854_s13] ss:$0 sm:$0xff] }
 0x6f4   :  { %v3219_v37 = vpop.eup %3218 }
 0x6f5   :  { %v797_v38 = vsel %vm358_vm3, %v3219_v37, 0.0  ;;  %v3221_v43 = vpop.eup %3220 }
 0x6f6   :  { %798 = vadd.xlane.f32.xlu0 %v797_v38  ;;  %v802_v44 = vmul.f32 %v3221_v43, %v3217_v24  ;;  %v1203_v38 = vld [vmem:[%s3852_s11 + $0x28] sm:$0xff]  ;;  %v1205_v43 = vld [vmem:[%s3852_s11 + $0x38] sm:$0xff] }
 0x70c   :  { %804 = vrot.lane.b32.xlu0 %v3465_v41, %s3320_s26  ;;  %v2727_v41 = vld [vmem:[%s3846_s5 + $0x18] sm:$0xff] }
 0x70d   :  { %v3110_v48 = vpack.c.bf16 %v2727_v41, %v2726_v47 }
 0x70f   :  { %3111 = vmatprep.subr.bf16.mxu0 %v3110_v48 }
 0x783   :  { %v799_v42 = vpop.xlane.xlu0 %798 }
 0x784   :  { %3222 = vrcp.f32 %v799_v42  ;;  %v1204_v42 = vld [vmem:[%s3852_s11 + $0x30] sm:$0xff] }
 0x787   :  { %v805_v39 = vpop.permute.xlu0 %804 }
 0x788   :  { %2946 = vmatpush3.msra.mxu1 %v805_v39  ;;  %v2732_v39 = vld [vmem:[%s3851_s10] ss:$0 sm:$0xff] }
 0x789   :  { %2948 = vmatmul.mubr.msk.f32.vlgmr.msra.gmra.mrb[10].mxu1 %vm358_vm3, %v802_v44  ;;  %v3134_v44 = vpack.c.bf16 %v1205_v43, %v1204_v42 }
 0x78e   :  { %v3223_v45 = vpop.eup %3222 }
 0x78f   :  { %v803_v46 = vmul.f32 %v3223_v45, %v3219_v37  ;;  %v1202_v37 = vld [vmem:[%s3852_s11 + $0x20] sm:$0xff] }
 0x790   :  { %v3130_v40 = vpack.c.bf16 %v1203_v38, %v1202_v37 }
 0x791   :  { %2953 = vmatmul.mubr.msk.f32.vlgmr.msra.gmra.mrb[6].mxu0 %vm358_vm3, %v803_v46 }
 0x792   :  { %3113 = vmatpush3.bf16.msra.mxu0 %v3110_v48 }
 0x793   :  { %3123 = vmatprep.subr.bf16.mxu0 %v3122_v30 }
 0x85c   :  { %v876_v49 = vpop.f32.mrb[10].mxu1 }
 0x85d   :  { %v2949_v50 = vpop.f32.mrb[11].mxu1  ;;  %2959 = vmatprep.mubr.msk.f32.mxu0 %vm204_vm2, %v876_v49 }
 0x864   :  { %v952_v51 = vpop.f32.mrb[6].mxu0 }
 0x865   :  { %v2954_v52 = vpop.f32.mrb[7].mxu0  ;;  %2960 = vmatmul.mubr.msk.f32.vlgmr.msra.gmra.mrb[2].mxu0 %vm204_vm2, %v952_v51 }
 0x866   :  { %3125 = vmatpush3.bf16.msra.mxu0 %v3122_v30 }
 0x867   :  { %3127 = vmatprep.subr.bf16.mxu0 %v3126_v34 }
 0x86a   :  { %3129 = vmatpush3.bf16.msra.mxu0 %v3126_v34 }
 0x86b   :  { %3131 = vmatprep.subr.bf16.mxu0 %v3130_v40 }
 0x86e   :  { %3133 = vmatpush3.bf16.msra.mxu0 %v3130_v40  ;;  %v2739_v40 = vld [vmem:[%s3855_s14] ss:$0 sm:$0xff] }
 0x86f   :  { %3135 = vmatprep.subr.bf16.mxu0 %v3134_v44 }
 0x872   :  { %3137 = vmatpush3.bf16.msra.mxu0 %v3134_v44 }
 0x873   :  { %3013 = vmatprep.subr.mxu0 %v3314_v36 }
 0x938   :  { %v2961_v54 = vpop.f32.mrb[2].mxu0 }
 0x939   :  { %v3184_v55 = vadd.f32 %v2961_v54, %v2719_v53  ;;  %v1031_v56 = vpop.f32.mrb[3].mxu0 }
 0x93a   :  { %v3185_v57 = vadd.f32 %v2719_v53, %v1031_v56 }
 0x93b   :  { %v1043_v58 = vadd.f32 %v3184_v55, %v3453_v35 }
 0x93c   :  { %v1042_v59 = vadd.f32 %v3185_v57, %v3449_v33  ;;  %v1088_v33 = vld [vmem:[%s3850_s9] sm:$0xff] }
 0x93d   :  { %v1049_v60 = vsel %vm64_vm0, %v1043_v58, 0.0  ;;  %v3114_v8 = vpack.c.bf16 %v1089_v7, %v1088_v33 }
 0x93e   :  { %1050 = vadd.xlane.f32.xlu0 %v1049_v60  ;;  %v1046_v61 = vsel %vm64_vm0, %v1042_v59, 0.0 }
 0x93f   :  { %1047 = vadd.xlane.f32.xlu1 %v1046_v61  ;;  %3115 = vmatprep.subr.bf16.mxu1 %v3114_v8 }
 0x940   :  { %3117 = vmatpush3.bf16.msra.mxu1 %v3114_v8 }
 0x941   :  { %3119 = vmatprep.subr.bf16.mxu1 %v3118_v11 }
 0x944   :  { %3121 = vmatpush3.bf16.msra.mxu1 %v3118_v11 }
 0x9cb   :  { %v1051_v62 = vpop.xlane.xlu0 %1050 }
 0x9cc   :  { %v1053_v63 = vmul.f32 0.03125, %v1051_v62  ;;  %v1048_v0 = vpop.xlane.xlu1 %1047 }
 0x9cd   :  { %v1052_v1 = vmul.f32 0.03125, %v1048_v0 }
 0x9ce   :  { %v1055_v2 = vsub.f32 %v1043_v58, %v1053_v63 }
 0x9cf   :  { %v1054_v3 = vsub.f32 %v1042_v59, %v1052_v1 }
 0x9d0   :  { %v1057_v4 = vmul.f32 %v1055_v2, %v1055_v2 }
 0x9d1   :  { %v1056_v5 = vmul.f32 %v1054_v3, %v1054_v3 }
 0x9d2   :  { %v1061_v6 = vsel %vm64_vm0, %v1057_v4, 0.0 }
 0x9d3   :  { %1062 = vadd.xlane.f32.xlu1 %v1061_v6  ;;  %v1058_v35 = vsel %vm64_vm0, %v1056_v5, 0.0 }
 0x9d4   :  { %1059 = vadd.xlane.f32.xlu0 %v1058_v35 }
 0xa60   :  { %v1063_v12 = vpop.xlane.xlu1 %1062 }
 0xa61   :  { %v1065_v13 = vmul.f32 0.03125, %v1063_v12  ;;  %v1060_v14 = vpop.xlane.xlu0 %1059 }
 0xa62   :  { %v1064_v15 = vmul.f32 0.03125, %v1060_v14 }
 0xa63   :  { %v1067_v16 = vadd.f32 1e-12, %v1065_v13 }
 0xa64   :  { %v1066_v17 = vadd.f32 1e-12, %v1064_v15 }
 0xa65   :  { %3224 = vrsqrt.f32 %v1067_v16 }
 0xa66   :  { %3226 = vrsqrt.f32 %v1066_v17 }
 0xa6f   :  { %v3225_v18 = vpop.eup %3224 }
 0xa70   :  { %v3227_v20 = vpop.eup %3226  ;;  %v1071_v21 = vmul.f32 %v3225_v18, %v1055_v2  ;;  %v2735_v2 = vld [vmem:[%s3853_s12] ss:$0 sm:$0xff] }
 0xa71   :  { %v1070_v22 = vmul.f32 %v3227_v20, %v1054_v3  ;;  %v2741_v20 = vld [vmem:[%s3844_s3 + $0x28] sm:$0xff] }
 0xa72   :  { %v1079_v24 = vmul.f32 %v2730_v19, %v1071_v21 }
 0xa73   :  { %v1078_v25 = vmul.f32 %v2730_v19, %v1070_v22  ;;  %v2740_v19 = vld [vmem:[%s3844_s3 + $0x20] sm:$0xff]  ;;  %v2742_v22 = vld [vmem:[%s3844_s3 + $0x30] sm:$0xff] }
 0xa74   :  { %v1087_v27 = vadd.f32 %v2731_v23, %v1079_v24  ;;  %v3138_v21 = vpack.c.bf16 %v2741_v20, %v2740_v19 }
 0xa75   :  { %v1086_v26 = vadd.f32 %v2731_v23, %v1078_v25  ;;  %v2743_v23 = vld [vmem:[%s3844_s3 + $0x38] sm:$0xff] }
 0xa76   :  { %3139 = vmatprep.subr.bf16.mxu1 %v3138_v21  ;;  %v3142_v24 = vpack.c.bf16 %v2743_v23, %v2742_v22 }
 0xa77   :  { %2970 = vmatprep.mubr.msk.f32.mxu1 %vm64_vm0, %v1086_v26 }
 0xa78   :  { %2971 = vmatmul.mubr.msk.f32.vlgmr.msra.gmra.mrb[12].mxu1 %vm64_vm0, %v1087_v27 }
 0xa79   :  { %3141 = vmatpush3.bf16.msra.mxu1 %v3138_v21 }
 0xa7a   :  { %3143 = vmatprep.subr.bf16.mxu1 %v3142_v24 }
 0xa7d   :  { %3145 = vmatpush3.bf16.msra.mxu1 %v3142_v24 }
 0xa7e   :  { %3003 = vmatprep.subr.mxu1 %v3314_v36 }
 0xb4b   :  { %v2972_v45 = vpop.f32.mrb[12].mxu1 }
 0xb4c   :  { %v1177_v46 = vadd.f32 %v2972_v45, %v2732_v39  ;;  %v1171_v47 = vpop.f32.mrb[13].mxu1  ;;  %v2745_v45 = vld [vmem:[%s3845_s4 + $0x1] ss:$0 sm:$0xff] }
 0xb4d   :  { %v1172_v41 = vadd.f32 %v2732_v39, %v1171_v47 }
 0xb4e   :  { %v1181_v48 = vmul.f32 %v1177_v46, %v1177_v46 }
 0xb4f   :  { %v1180_v49 = vmul.f32 %v1172_v41, %v1172_v41 }
 0xb50   :  { %v1183_v50 = vmul.f32 %v1181_v48, %v1177_v46 }
 0xb51   :  { %v1182_v51 = vmul.f32 %v1180_v49, %v1172_v41 }
 0xb52   :  { %v1185_v52 = vmul.f32 0.044715, %v1183_v50 }
 0xb53   :  { %v1184_v53 = vmul.f32 0.044715, %v1182_v51 }
 0xb54   :  { %v1187_v54 = vadd.f32 %v1185_v52, %v1177_v46 }
 0xb55   :  { %v1186_v55 = vadd.f32 %v1184_v53, %v1172_v41 }
 0xb56   :  { %v1189_v56 = vmul.f32 0.7978846, %v1187_v54 }
 0xb57   :  { %v1188_v57 = vmul.f32 0.7978846, %v1186_v55 }
 0xb58   :  { %3228 = vtanh.f32 %v1189_v56 }
 0xb59   :  { %3230 = vtanh.f32 %v1188_v57 }
 0xb62   :  { %v3229_v58 = vpop.eup %3228 }
 0xb63   :  { %v3231_v59 = vpop.eup %3230  ;;  %v1193_v60 = vadd.f32 1.0, %v3229_v58 }
 0xb64   :  { %v1192_v61 = vadd.f32 1.0, %v3231_v59 }
 0xb65   :  { %v1195_v62 = vmul.f32 0.5, %v1193_v60 }
 0xb66   :  { %v1194_v63 = vmul.f32 0.5, %v1192_v61 }
 0xb67   :  { %v1197_v1 = vmul.f32 %v1195_v62, %v1177_v46 }
 0xb68   :  { %v1196_v0 = vmul.f32 %v1194_v63, %v1172_v41 }
 0xb6a   :  { %2989 = vmatprep.mubr.msk.f32.mxu0 %vm1213_vm4, %v1196_v0 }
 0xb6b   :  { %2990 = vmatmul.mubr.msk.f32.vlgmr.msra.gmra.mrb[8].mxu0 %vm1213_vm4, %v1197_v1 }
 0xb6c   :  { %3015 = vmatprep.mubr.msk.f32.mxu0 %vm3315_vm1, %v3314_v36 }
 0xc3e   :  { %v2991_v3 = vpop.f32.mrb[8].mxu0 }
 0xc3f   :  { %v1292_v4 = vadd.f32 %v2991_v3, %v2735_v2  ;;  %v1286_v5 = vpop.f32.mrb[9].mxu0 }
 0xc40   :  { %v1287_v6 = vadd.f32 %v2735_v2, %v1286_v5  ;;  %v2755_v5 = vld [vmem:[%s3846_s5 + $0x20] sm:$0xff] }
 0xc41   :  { %v1296_v35 = vadd.f32 %v1292_v4, %v1087_v27 }
 0xc42   :  { %v1295_v33 = vadd.f32 %v1287_v6, %v1086_v26  ;;  %v2756_v6 = vld [vmem:[%s3846_s5 + $0x28] sm:$0xff] }
 0xc43   :  { %v1302_v7 = vsel %vm64_vm0, %v1296_v35, 0.0 }
 0xc44   :  { %1303 = vadd.xlane.f32.xlu1 %v1302_v7  ;;  %v1299_v8 = vsel %vm64_vm0, %v1295_v33, 0.0 }
 0xc45   :  { %1300 = vadd.xlane.f32.xlu0 %v1299_v8 }
 0xcd1   :  { %v1304_v9 = vpop.xlane.xlu1 %1303 }
 0xcd2   :  { %v1306_v10 = vmul.f32 0.03125, %v1304_v9  ;;  %v1301_v11 = vpop.xlane.xlu0 %1300 }
 0xcd3   :  { %v1305_v12 = vmul.f32 0.03125, %v1301_v11 }
 0xcd4   :  { %v1308_v13 = vsub.f32 %v1296_v35, %v1306_v10 }
 0xcd5   :  { %v1307_v14 = vsub.f32 %v1295_v33, %v1305_v12  ;;  %v3146_v33 = vpack.c.bf16 %v2756_v6, %v2755_v5 }
 0xcd6   :  { %v1310_v15 = vmul.f32 %v1308_v13, %v1308_v13 }
 0xcd7   :  { %v1309_v16 = vmul.f32 %v1307_v14, %v1307_v14 }
 0xcd8   :  { %v1314_v17 = vsel %vm64_vm0, %v1310_v15, 0.0 }
 0xcd9   :  { %1315 = vadd.xlane.f32.xlu1 %v1314_v17  ;;  %v1311_v18 = vsel %vm64_vm0, %v1309_v16, 0.0 }
 0xcda   :  { %1312 = vadd.xlane.f32.xlu0 %v1311_v18 }
 0xd66   :  { %v1316_v25 = vpop.xlane.xlu1 %1315 }
 0xd67   :  { %v1318_v26 = vmul.f32 0.03125, %v1316_v25  ;;  %v1313_v27 = vpop.xlane.xlu0 %1312 }
 0xd68   :  { %v1317_v28 = vmul.f32 0.03125, %v1313_v27 }
 0xd69   :  { %v1320_v29 = vadd.f32 1e-12, %v1318_v26 }
 0xd6a   :  { %v1319_v30 = vadd.f32 1e-12, %v1317_v28 }
 0xd6b   :  { %3232 = vrsqrt.f32 %v1320_v29 }
 0xd6c   :  { %3234 = vrsqrt.f32 %v1319_v30 }
 0xd75   :  { %v3233_v31 = vpop.eup %3232 }
 0xd76   :  { %v3235_v34 = vpop.eup %3234  ;;  %v1324_v37 = vmul.f32 %v3233_v31, %v1308_v13 }
 0xd77   :  { %v1323_v38 = vmul.f32 %v3235_v34, %v1307_v14 }
 0xd78   :  { %v1332_v42 = vmul.f32 %v2738_v32, %v1324_v37 }
 0xd79   :  { %v1331_v43 = vmul.f32 %v2738_v32, %v1323_v38 }
 0xd7a   :  { %v3635_v39 = vadd.f32 %v2739_v40, %v1332_v42 }
 0xd7b   :  { %v3633_v44 = vadd.f32 %v2739_v40, %v1331_v43 }
 0xd7d   :  { %3000 = vmatprep.mubr.msk.f32.mxu1 %vm64_vm0, %v3633_v44 }
 0xd7e   :  { %3001 = vmatmul.mubr.msk.f32.vlgmr.msra.gmra.mrb[14].mxu1 %vm64_vm0, %v3635_v39 }
 0xd7f   :  { %3005 = vmatprep.mubr.msk.f32.mxu1 %vm3315_vm1, %v3314_v36 }
 0xe51   :  { %v3002_v46 = vpop.f32.mrb[14].mxu1 }
 0xe52   :  { %v3646_v47 = vadd.f32 %v3002_v46, %v2745_v45  ;;  %v1426_v41 = vpop.f32.mrb[15].mxu1 }
 0xe53   :  { %v3648_v48 = vadd.f32 %v2745_v45, %v1426_v41 }
 0xe54   :  { %1515 = vrot.lane.b32.xlu1 %v3646_v47, %s3316_s1 }
 0xe55   :  { %1438 = vrot.lane.b32.xlu0 %v3648_v48, %s3316_s1 }
 0xec6   :  { %v1516_v50 = vpop.permute.xlu1 %1515 }
 0xec7   :  { %v1439_v49 = vpop.permute.xlu0 %1438 }
 0xec8   :  { %3004 = vmatpush3.xpose.msk.msra.mxu1 %vm204_vm2, %v1439_v49 }
 0xec9   :  { %3008 = vmatprep.subr.mxu1 %v3314_v36 }
 0xecb   :  { %3006 = vmatmul.mubr.msk.f32.vlgmr.msra.gmra.mrb[16].mxu1 %vm204_vm2, %v3648_v48 }
 0xecc   :  { %3009 = vmatpush3.xpose.msk.msra.mxu1 %vm204_vm2, %v1516_v50  ;;  %3010 = vmatprep.mubr.msk.f32.mxu1 %vm3315_vm1, %v3314_v36 }
 0xecd   :  { %3018 = vmatprep.subr.mxu1 %v3314_v36 }
 0xecf   :  { %3011 = vmatmul.mubr.msk.f32.vlgmr.msra.gmra.mrb[18].mxu1 %vm204_vm2, %v3646_v47 }
 0xed0   :  { %3020 = vmatprep.mubr.msk.f32.mxu1 %vm3315_vm1, %v3314_v36 }
 0xf9e   :  { %v1510_v51 = vpop.f32.mrb[16].mxu1 }
 0xf9f   :  { %v1591_v52 = vmul.f32 0.25, %v1510_v51  ;;  %v3007_v53 = vpop.f32.mrb[17].mxu1 }
 0xfa1   :  { %v1593_v54 = vsel %vm358_vm3, %v1591_v52, -inf }
 0xfa2   :  { %1594 = vmax.xlane.f32.xlu1 %v1593_v54  ;;  %v1587_v55 = vpop.f32.mrb[18].mxu1  ;;  %v2766_v54 = vld [vmem:[%s3846_s5 + $0x30] sm:$0xff] }
 0xfa3   :  { %v1592_v56 = vmul.f32 0.25, %v1587_v55  ;;  %v3012_v57 = vpop.f32.mrb[19].mxu1 }
 0xfa5   :  { %v1596_v58 = vsel %vm358_vm3, %v1592_v56, -inf }
 0xfa6   :  { %1597 = vmax.xlane.f32.xlu0 %v1596_v58 }
0x102f   :  { %v1595_v59 = vpop.xlane.xlu1 %1594 }
0x1030   :  { %v1599_v60 = vsub.f32 %v1591_v52, %v1595_v59 }
0x1032   :  { %v1601_v61 = vmul.f32 1.442695, %v1599_v60  ;;  %v2759_v60 = vld [vmem:[%s3847_s6 + $0x1] ss:$0 sm:$0xff] }
0x1033   :  { %v1598_v62 = vpop.xlane.xlu0 %1597 }
0x1034   :  { %3236 = vpow2.f32 %v1601_v61  ;;  %v1600_v63 = vsub.f32 %v1592_v56, %v1598_v62 }
0x1036   :  { %v1603_v0 = vmul.f32 1.442695, %v1600_v63 }
0x1038   :  { %3238 = vpow2.f32 %v1603_v0 }
0x103e   :  { %v3237_v1 = vpop.eup %3236 }
0x103f   :  { %v1605_v2 = vsel %vm358_vm3, %v3237_v1, 0.0 }
0x1040   :  { %1606 = vadd.xlane.f32.xlu0 %v1605_v2 }
0x1042   :  { %v3239_v3 = vpop.eup %3238 }
0x1043   :  { %v1608_v4 = vsel %vm358_vm3, %v3239_v3, 0.0 }
0x1044   :  { %1609 = vadd.xlane.f32.xlu1 %v1608_v4 }
0x1055   :  { %1691 = vrot.lane.b32.xlu1 %v3646_v47, %s3317_s20 }
0x1056   :  { %1615 = vrot.lane.b32.xlu0 %v3648_v48, %s3317_s20 }
0x1059   :  { %1861 = vrot.lane.b32.xlu1 %v3648_v48, %s3318_s21 }
0x105a   :  { %1859 = vrot.lane.b32.xlu0 %v3648_v48, %s3319_s22 }
0x105d   :  { %1939 = vrot.lane.b32.xlu1 %v3646_v47, %s3318_s21 }
0x1061   :  { %1937 = vrot.lane.b32.xlu1 %v3646_v47, %s3319_s22 }
0x10cd   :  { %v1607_v35 = vpop.xlane.xlu0 %1606 }
0x10ce   :  { %3240 = vrcp.f32 %v1607_v35 }
0x10d1   :  { %v1610_v7 = vpop.xlane.xlu1 %1609  ;;  %v1616_v8 = vpop.permute.xlu0 %1615 }
0x10d2   :  { %3242 = vrcp.f32 %v1610_v7  ;;  %3014 = vmatpush3.msra.mxu0 %v1616_v8 }
0x10d3   :  { %3147 = vmatprep.subr.bf16.mxu0 %v3146_v33 }
0x10d5   :  { %v1692_v9 = vpop.permute.xlu1 %1691  ;;  %v1860_v15 = vpop.permute.xlu0 %1859 }
0x10d6   :  { %3019 = vmatpush3.msra.mxu1 %v1692_v9 }
0x10d7   :  { %3030 = vmatprep.subr.mxu1 %v3314_v36 }
0x10d8   :  { %v3241_v10 = vpop.eup %3240 }
0x10d9   :  { %v1613_v11 = vmul.f32 %v3241_v10, %v3237_v1  ;;  %v1862_v14 = vpop.permute.xlu1 %1861 }
0x10db   :  { %3016 = vmatmul.mubr.msk.f32.vlgmr.msra.gmra.mrb[10].mxu0 %vm358_vm3, %v1613_v11 }
0x10dc   :  { %v3243_v12 = vpop.eup %3242  ;;  %3149 = vmatpush3.bf16.msra.mxu0 %v3146_v33 }
0x10dd   :  { %v1614_v13 = vmul.f32 %v3243_v12, %v3239_v3  ;;  %3035 = vmatprep.subr.mxu0 %v3314_v36  ;;  %v1940_v18 = vpop.permute.xlu1 %1939  ;;  %v2775_v12 = vld [vmem:[%s3850_s9 + $0x28] sm:$0xff] }
0x10df   :  { %3021 = vmatmul.mubr.msk.f32.vlgmr.msra.gmra.mrb[20].mxu1 %vm358_vm3, %v1614_v13 }
0x10e0   :  { %3031 = vmatpush3.xpose.msk.msra.mxu1 %vm204_vm2, %v1862_v14  ;;  %3032 = vmatprep.mubr.msk.f32.mxu1 %vm3315_vm1, %v3314_v36  ;;  %v2776_v14 = vld [vmem:[%s3850_s9 + $0x30] sm:$0xff] }
0x10e1   :  { %3040 = vmatprep.subr.mxu1 %v3314_v36  ;;  %v1938_v21 = vpop.permute.xlu1 %1937 }
0x10e3   :  { %3033 = vmatmul.mubr.msk.f32.vlgmr.msra.gmra.mrb[22].mxu1 %vm204_vm2, %v1860_v15  ;;  %v2777_v15 = vld [vmem:[%s3850_s9 + $0x38] sm:$0xff] }
0x10e4   :  { %3042 = vmatprep.mubr.msk.f32.mxu1 %vm3315_vm1, %v3314_v36 }
0x11ae   :  { %v1687_v16 = vpop.f32.mrb[10].mxu0 }
0x11af   :  { %v3017_v17 = vpop.f32.mrb[11].mxu0  ;;  %3027 = vmatprep.mubr.msk.f32.mxu0 %vm204_vm2, %v1687_v16  ;;  %v3158_v16 = vpack.c.bf16 %v2777_v15, %v2776_v14 }
0x11b2   :  { %v1763_v19 = vpop.f32.mrb[20].mxu1 }
0x11b3   :  { %v3022_v20 = vpop.f32.mrb[21].mxu1  ;;  %3028 = vmatmul.mubr.msk.f32.vlgmr.msra.gmra.mrb[12].mxu0 %vm204_vm2, %v1763_v19 }
0x11b4   :  { %3036 = vmatpush3.xpose.msk.msra.mxu0 %vm204_vm2, %v1940_v18  ;;  %3037 = vmatprep.mubr.msk.f32.mxu0 %vm3315_vm1, %v3314_v36 }
0x11b5   :  { %3045 = vmatprep.subr.mxu0 %v3314_v36 }
0x11b6   :  { %v1933_v22 = vpop.f32.mrb[22].mxu1 }
0x11b7   :  { %v2015_v23 = vmul.f32 0.25, %v1933_v22  ;;  %v3034_v24 = vpop.f32.mrb[23].mxu1  ;;  %3038 = vmatmul.mubr.msk.f32.vlgmr.msra.gmra.mrb[14].mxu0 %vm204_vm2, %v1938_v21 }
0x11b8   :  { %3047 = vmatprep.mubr.msk.f32.mxu0 %vm3315_vm1, %v3314_v36  ;;  %v2772_v24 = vld [vmem:[%s3848_s7 + $0x1] ss:$0 sm:$0xff] }
0x11b9   :  { %v2017_v25 = vsel %vm358_vm3, %v2015_v23, -inf }
0x11ba   :  { %2018 = vmax.xlane.f32.xlu0 %v2017_v25 }
0x1247   :  { %v2019_v26 = vpop.xlane.xlu0 %2018 }
0x1248   :  { %v2023_v27 = vsub.f32 %v2015_v23, %v2019_v26 }
0x124a   :  { %v2025_v28 = vmul.f32 1.442695, %v2023_v27 }
0x124c   :  { %3244 = vpow2.f32 %v2025_v28  ;;  %v2773_v28 = vld [vmem:[%s3849_s8 + $0x1] ss:$0 sm:$0xff] }
0x1256   :  { %v3245_v29 = vpop.eup %3244 }
0x1257   :  { %v2029_v30 = vsel %vm358_vm3, %v3245_v29, 0.0 }
0x1258   :  { %2030 = vadd.xlane.f32.xlu0 %v2029_v30 }
0x128a   :  { %v2011_v31 = vpop.f32.mrb[14].mxu0 }
0x128b   :  { %v2016_v32 = vmul.f32 0.25, %v2011_v31  ;;  %v3039_v34 = vpop.f32.mrb[15].mxu0 }
0x128c   :  { %v2782_v34 = vld [vmem:[%s3852_s11 + $0x40] sm:$0xff] }
0x128d   :  { %v2020_v37 = vsel %vm358_vm3, %v2016_v32, -inf }
0x128e   :  { %2021 = vmax.xlane.f32.xlu1 %v2020_v37  ;;  %v2783_v37 = vld [vmem:[%s3852_s11 + $0x48] sm:$0xff] }
0x129f   :  { %2115 = vrot.lane.b32.xlu1 %v3646_v47, %s3320_s26 }
0x12e5   :  { %v2031_v41 = vpop.xlane.xlu0 %2030 }
0x131b   :  { %v2022_v38 = vpop.xlane.xlu1 %2021 }
0x131c   :  { %v2024_v40 = vsub.f32 %v2016_v32, %v2022_v38  ;;  %v3162_v38 = vpack.c.bf16 %v2783_v37, %v2782_v34 }
0x131e   :  { %v2027_v42 = vmul.f32 1.442695, %v2024_v40  ;;  %v2784_v40 = vld [vmem:[%s3852_s11 + $0x50] sm:$0xff] }
0x131f   :  { %v2116_v43 = vpop.permute.xlu1 %2115 }
0x1320   :  { %3246 = vpow2.f32 %v2027_v42  ;;  %3046 = vmatpush3.msra.mxu0 %v2116_v43  ;;  %v2785_v42 = vld [vmem:[%s3852_s11 + $0x58] sm:$0xff]  ;;  %v2786_v43 = vld [vmem:[%s3852_s11 + $0x60] sm:$0xff] }
0x1321   :  { %3248 = vrcp.f32 %v2031_v41  ;;  %v2788_v41 = vld [vmem:[%s3852_s11 + $0x70] sm:$0xff] }
0x132a   :  { %v3247_v45 = vpop.eup %3246 }
0x132b   :  { %v2032_v46 = vsel %vm358_vm3, %v3247_v45, 0.0  ;;  %v3249_v50 = vpop.eup %3248 }
0x132c   :  { %2033 = vadd.xlane.f32.xlu0 %v2032_v46  ;;  %v2037_v51 = vmul.f32 %v3249_v50, %v3245_v29 }
0x1342   :  { %2039 = vrot.lane.b32.xlu0 %v3648_v48, %s3320_s26  ;;  %v2767_v48 = vld [vmem:[%s3846_s5 + $0x38] sm:$0xff] }
0x1343   :  { %v3150_v55 = vpack.c.bf16 %v2767_v48, %v2766_v54 }
0x1345   :  { %3151 = vmatprep.subr.bf16.mxu0 %v3150_v55 }
0x13b9   :  { %v2034_v49 = vpop.xlane.xlu0 %2033 }
0x13ba   :  { %3250 = vrcp.f32 %v2034_v49  ;;  %v2789_v49 = vld [vmem:[%s3852_s11 + $0x78] sm:$0xff] }
0x13bb   :  { %v3174_v50 = vpack.c.bf16 %v2789_v49, %v2788_v41 }
0x13bd   :  { %v2040_v47 = vpop.permute.xlu0 %2039 }
0x13be   :  { %3041 = vmatpush3.msra.mxu1 %v2040_v47 }
0x13bf   :  { %3043 = vmatmul.mubr.msk.f32.vlgmr.msra.gmra.mrb[24].mxu1 %vm358_vm3, %v2037_v51  ;;  %v2779_v51 = vld [vmem:[%s3851_s10 + $0x1] ss:$0 sm:$0xff] }
0x13c4   :  { %v3251_v52 = vpop.eup %3250 }
0x13c5   :  { %v2038_v53 = vmul.f32 %v3251_v52, %v3247_v45  ;;  %v2787_v45 = vld [vmem:[%s3852_s11 + $0x68] sm:$0xff] }
0x13c6   :  { %v3170_v46 = vpack.c.bf16 %v2787_v45, %v2786_v43 }
0x13c7   :  { %3048 = vmatmul.mubr.msk.f32.vlgmr.msra.gmra.mrb[16].mxu0 %vm358_vm3, %v2038_v53 }
0x13c8   :  { %3153 = vmatpush3.bf16.msra.mxu0 %v3150_v55 }
0x13c9   :  { %3163 = vmatprep.subr.bf16.mxu0 %v3162_v38 }
0x1492   :  { %v2111_v56 = vpop.f32.mrb[24].mxu1 }
0x1493   :  { %v3044_v57 = vpop.f32.mrb[25].mxu1  ;;  %3054 = vmatprep.mubr.msk.f32.mxu0 %vm204_vm2, %v2111_v56 }
0x149a   :  { %v2187_v58 = vpop.f32.mrb[16].mxu0 }
0x149b   :  { %v3049_v59 = vpop.f32.mrb[17].mxu0  ;;  %3055 = vmatmul.mubr.msk.f32.vlgmr.msra.gmra.mrb[12].mxu0 %vm204_vm2, %v2187_v58 }
0x149c   :  { %3165 = vmatpush3.bf16.msra.mxu0 %v3162_v38 }
0x156e   :  { %v3056_v61 = vpop.f32.mrb[12].mxu0 }
0x156f   :  { %v3186_v62 = vadd.f32 %v3056_v61, %v2759_v60  ;;  %v2266_v63 = vpop.f32.mrb[13].mxu0 }
0x1570   :  { %v3187_v0 = vadd.f32 %v2759_v60, %v2266_v63 }
0x1571   :  { %v2278_v1 = vadd.f32 %v3186_v62, %v3635_v39 }
0x1572   :  { %v2277_v2 = vadd.f32 %v3187_v0, %v3633_v44  ;;  %v2774_v44 = vld [vmem:[%s3850_s9 + $0x20] sm:$0xff] }
0x1573   :  { %v2286_v3 = vsel %vm64_vm0, %v2278_v1, 0.0  ;;  %v3154_v13 = vpack.c.bf16 %v2775_v12, %v2774_v44 }
0x1574   :  { %2287 = vadd.xlane.f32.xlu0 %v2286_v3  ;;  %v2283_v4 = vsel %vm64_vm0, %v2277_v2, 0.0 }
0x1575   :  { %2284 = vadd.xlane.f32.xlu1 %v2283_v4  ;;  %3155 = vmatprep.subr.bf16.mxu1 %v3154_v13 }
0x1576   :  { %3157 = vmatpush3.bf16.msra.mxu1 %v3154_v13 }
0x1577   :  { %3159 = vmatprep.subr.bf16.mxu1 %v3158_v16 }
0x157a   :  { %3161 = vmatpush3.bf16.msra.mxu1 %v3158_v16 }
0x1601   :  { %v2288_v5 = vpop.xlane.xlu0 %2287 }
0x1602   :  { %v2290_v6 = vmul.f32 0.03125, %v2288_v5  ;;  %v2285_v35 = vpop.xlane.xlu1 %2284 }
0x1603   :  { %v2289_v33 = vmul.f32 0.03125, %v2285_v35 }
0x1604   :  { %v2292_v7 = vsub.f32 %v2278_v1, %v2290_v6 }
0x1605   :  { %v2291_v8 = vsub.f32 %v2277_v2, %v2289_v33  ;;  %v2791_v33 = vld [vmem:[%s3853_s12 + $0x1] ss:$0 sm:$0xff] }
0x1606   :  { %v2294_v9 = vmul.f32 %v2292_v7, %v2292_v7 }
0x1607   :  { %v2293_v10 = vmul.f32 %v2291_v8, %v2291_v8 }
0x1608   :  { %v2298_v11 = vsel %vm64_vm0, %v2294_v9, 0.0 }
0x1609   :  { %2299 = vadd.xlane.f32.xlu1 %v2298_v11  ;;  %v2295_v39 = vsel %vm64_vm0, %v2293_v10, 0.0 }
0x160a   :  { %2296 = vadd.xlane.f32.xlu0 %v2295_v39 }
0x1696   :  { %v2300_v17 = vpop.xlane.xlu1 %2299 }
0x1697   :  { %v2302_v18 = vmul.f32 0.03125, %v2300_v17  ;;  %v2297_v19 = vpop.xlane.xlu0 %2296 }
0x1698   :  { %v2301_v20 = vmul.f32 0.03125, %v2297_v19 }
0x1699   :  { %v2304_v21 = vadd.f32 1e-12, %v2302_v18 }
0x169a   :  { %v2303_v22 = vadd.f32 1e-12, %v2301_v20 }
0x169b   :  { %3252 = vrsqrt.f32 %v2304_v21 }
0x169c   :  { %3254 = vrsqrt.f32 %v2303_v22 }
0x16a5   :  { %v3253_v23 = vpop.eup %3252 }
0x16a6   :  { %v3255_v25 = vpop.eup %3254  ;;  %v2308_v26 = vmul.f32 %v3253_v23, %v2292_v7  ;;  %v2585_v23 = vld [vmem:[%s3856_s15] sm:$0xff] }
0x16a7   :  { %v2307_v27 = vmul.f32 %v3255_v25, %v2291_v8 }
0x16a8   :  { %v2316_v29 = vmul.f32 %v2772_v24, %v2308_v26  ;;  %v2587_v26 = vld [vmem:[%s3856_s15 + $0x10] sm:$0xff] }
0x16a9   :  { %v2315_v30 = vmul.f32 %v2772_v24, %v2307_v27  ;;  %v2586_v24 = vld [vmem:[%s3856_s15 + $0x8] sm:$0xff]  ;;  %v2588_v27 = vld [vmem:[%s3856_s15 + $0x18] sm:$0xff] }
0x16aa   :  { %v2324_v32 = vadd.f32 %v2773_v28, %v2316_v29  ;;  %v3179_v25 = vpack.c.bf16 %v2586_v24, %v2585_v23  ;;  %v3182_v29 = vpack.c.bf16 %v2588_v27, %v2587_v26 }
0x16ab   :  { %v2323_v31 = vadd.f32 %v2773_v28, %v2315_v30  ;;  %v3321_v28 = vmov 0.0|0.0  }
0x16ac   :  { %3178 = vmatprep.subr.bf16.mxu1 %v3321_v28 }
0x16ad   :  { %3065 = vmatprep.mubr.msk.f32.mxu1 %vm64_vm0, %v2323_v31 }
0x16ae   :  { %3066 = vmatmul.mubr.msk.f32.vlgmr.msra.gmra.mrb[26].mxu1 %vm64_vm0, %v2324_v32 }
0x16af   :  { %3095 = vmatprep.mubr.msk.f32.mxu1 %vm3315_vm1, %v3314_v36  ;;  %v3166_v36 = vpack.c.bf16 %v2785_v42, %v2784_v40  ;;  %3180 = vmatpush3.bf16.msra.mxu1 %v3179_v25  ;;  %v2796_v42 = vld [vmem:[%s3854_s13 + $0x1] ss:$0 sm:$0xff]  ;;  %s3322_s13 = smov [#allocation2]  }
0x16b0   :  { %3181 = vmatprep.subr.bf16.mxu1 %v3321_v28  ;;  %s2681_s22 = sshll.u32 %s3322_s13, 4  ;;  %s2682_s22 = int_to_ptr.vmem [resolvable:$true] %s2681_s22 }
0x16b1   :  { %3167 = vmatprep.subr.bf16.mxu0 %v3166_v36  ;;  %s3266_s26 = scalar_lea.vmem %s2682_s22, 256  ;;  %p3271_p1 = scmp.lt.s32.totalorder %s2682_s22, %s2682_s22 }
0x16b2   :  { %3169 = vmatpush3.bf16.msra.mxu0 %v3166_v36  ;;  %p3267_p0 = scmp.ne.s32.totalorder %s2682_s22, %s3266_s26  ;;  %p3272_p2 = scmp.lt.s32.totalorder %s3266_s26, %s3266_s26 }
0x16b3   :  { %3171 = vmatprep.subr.bf16.mxu0 %v3170_v46  ;;  %3183 = vmatpush3.bf16.msra.mxu1 %v3182_v29 }
0x16b4   :  { %p3273_p3 = por %p3272_p2, %p3271_p1 }
0x16b6   :  { %3173 = vmatpush3.bf16.msra.mxu0 %v3170_v46  ;;  %v2797_v46 = vld [vmem:[%s3855_s14 + $0x1] ss:$0 sm:$0xff]  ;;  %p3274_p4 = pnand %p3273_p3, %p3267_p0 }
0x16b7   :  { %3175 = vmatprep.subr.bf16.mxu0 %v3174_v50 }
0x16ba   :  { %3177 = vmatpush3.bf16.msra.mxu0 %v3174_v50 }
0x1781   :  { %v3067_v47 = vpop.f32.mrb[26].mxu1 }
0x1782   :  { %v2416_v52 = vadd.f32 %v3067_v47, %v2779_v51  ;;  %v2410_v53 = vpop.f32.mrb[27].mxu1 }
0x1783   :  { %v2411_v54 = vadd.f32 %v2779_v51, %v2410_v53 }
0x1784   :  { %v2420_v48 = vmul.f32 %v2416_v52, %v2416_v52 }
0x1785   :  { %v2419_v55 = vmul.f32 %v2411_v54, %v2411_v54 }
0x1786   :  { %v2422_v56 = vmul.f32 %v2420_v48, %v2416_v52 }
0x1787   :  { %v2421_v57 = vmul.f32 %v2419_v55, %v2411_v54 }
0x1788   :  { %v2424_v58 = vmul.f32 0.044715, %v2422_v56 }
0x1789   :  { %v2423_v59 = vmul.f32 0.044715, %v2421_v57 }
0x178a   :  { %v2426_v60 = vadd.f32 %v2424_v58, %v2416_v52 }
0x178b   :  { %v2425_v61 = vadd.f32 %v2423_v59, %v2411_v54 }
0x178c   :  { %v2428_v62 = vmul.f32 0.7978846, %v2426_v60 }
0x178d   :  { %v2427_v63 = vmul.f32 0.7978846, %v2425_v61 }
0x178e   :  { %3256 = vtanh.f32 %v2428_v62 }
0x178f   :  { %3258 = vtanh.f32 %v2427_v63 }
0x1798   :  { %v3257_v0 = vpop.eup %3256 }
0x1799   :  { %v3259_v1 = vpop.eup %3258  ;;  %v2432_v2 = vadd.f32 1.0, %v3257_v0 }
0x179a   :  { %v2431_v3 = vadd.f32 1.0, %v3259_v1 }
0x179b   :  { %v2434_v4 = vmul.f32 0.5, %v2432_v2 }
0x179c   :  { %v2433_v5 = vmul.f32 0.5, %v2431_v3 }
0x179d   :  { %v2436_v35 = vmul.f32 %v2434_v4, %v2416_v52 }
0x179e   :  { %v2435_v6 = vmul.f32 %v2433_v5, %v2411_v54 }
0x17a0   :  { %3084 = vmatprep.mubr.msk.f32.mxu0 %vm1213_vm4, %v2435_v6 }
0x17a1   :  { %3085 = vmatmul.mubr.msk.f32.vlgmr.msra.gmra.mrb[18].mxu0 %vm1213_vm4, %v2436_v35 }
0x1874   :  { %v3086_v7 = vpop.f32.mrb[18].mxu0 }
0x1875   :  { %v2532_v8 = vadd.f32 %v3086_v7, %v2791_v33  ;;  %v2526_v9 = vpop.f32.mrb[19].mxu0 }
0x1876   :  { %v2527_v10 = vadd.f32 %v2791_v33, %v2526_v9 }
0x1877   :  { %v2536_v11 = vadd.f32 %v2532_v8, %v2324_v32 }
0x1878   :  { %v2535_v39 = vadd.f32 %v2527_v10, %v2323_v31 }
0x1879   :  { %v2544_v44 = vsel %vm64_vm0, %v2536_v11, 0.0 }
0x187a   :  { %2545 = vadd.xlane.f32.xlu0 %v2544_v44  ;;  %v2541_v12 = vsel %vm64_vm0, %v2535_v39, 0.0 }
0x187b   :  { %2542 = vadd.xlane.f32.xlu1 %v2541_v12 }
0x1907   :  { %v2546_v13 = vpop.xlane.xlu0 %2545 }
0x1908   :  { %v2548_v14 = vmul.f32 0.03125, %v2546_v13  ;;  %v2543_v15 = vpop.xlane.xlu1 %2542 }
0x1909   :  { %v2547_v16 = vmul.f32 0.03125, %v2543_v15 }
0x190a   :  { %v2550_v17 = vsub.f32 %v2536_v11, %v2548_v14 }
0x190b   :  { %v2549_v18 = vsub.f32 %v2535_v39, %v2547_v16 }
0x190c   :  { %v2552_v19 = vmul.f32 %v2550_v17, %v2550_v17 }
0x190d   :  { %v2551_v20 = vmul.f32 %v2549_v18, %v2549_v18 }
0x190e   :  { %v2556_v21 = vsel %vm64_vm0, %v2552_v19, 0.0 }
0x190f   :  { %2557 = vadd.xlane.f32.xlu0 %v2556_v21  ;;  %v2553_v22 = vsel %vm64_vm0, %v2551_v20, 0.0 }
0x1910   :  { %2554 = vadd.xlane.f32.xlu1 %v2553_v22 }
0x199c   :  { %v2558_v30 = vpop.xlane.xlu0 %2557 }
0x199d   :  { %v2560_v31 = vmul.f32 0.03125, %v2558_v30  ;;  %v2555_v32 = vpop.xlane.xlu1 %2554 }
0x199e   :  { %v2559_v34 = vmul.f32 0.03125, %v2555_v32 }
0x199f   :  { %v2562_v37 = vadd.f32 1e-12, %v2560_v31 }
0x19a0   :  { %v2561_v38 = vadd.f32 1e-12, %v2559_v34 }
0x19a1   :  { %3260 = vrsqrt.f32 %v2562_v37 }
0x19a2   :  { %3262 = vrsqrt.f32 %v2561_v38 }
0x19ab   :  { %v3261_v40 = vpop.eup %3260 }
0x19ac   :  { %v3263_v36 = vpop.eup %3262  ;;  %v2566_v43 = vmul.f32 %v3261_v40, %v2550_v17 }
0x19ad   :  { %v2565_v45 = vmul.f32 %v3263_v36, %v2549_v18 }
0x19ae   :  { %v2574_v41 = vmul.f32 %v2796_v42, %v2566_v43 }
0x19af   :  { %v2573_v49 = vmul.f32 %v2796_v42, %v2565_v45 }
0x19b0   :  { %v2582_v50 = vadd.f32 %v2797_v46, %v2574_v41 }
0x19b1   :  { %v2581_v51 = vadd.f32 %v2797_v46, %v2573_v49 }
0x19b2   :  { %v2598_v47 = vrot.slane %v2582_v50, 7  ;;  %2584 = vst.msk [vmem:[#allocation2 + $0x8] sm:$0xff] %vm64_vm0, %v2582_v50 }
0x19b3   :  { %2583 = vst.msk [vmem:[#allocation2] sm:$0xff] %vm64_vm0, %v2581_v51 }
0x19b4   :  { %v2600_v52 = vsel %vm2599_vm5, %v2598_v47, %v2581_v51 }
0x19b5   :  { %3096 = vmatmul.mubr.msk.f32.vlgmr.msra.gmra.mrb[28].mxu1 %vm64_vm0, %v2600_v52 }
0x19b6   :  { %3277 = shalt.err (!%p3274_p4)
}
0x19b7   :  { %s3278_s0 = scalar_lea.hbm %s3858_s17, 256 }
0x19b8   :  { %p3279_p5 = scmp.ne.s32.totalorder %s3858_s17, %s3278_s0  ;;  %p3282_p6 = scmp.lt.u32.totalorder %s3278_s0, %s3858_s17 }
0x19ba   :  { %p3284_p7 = pnand %p3282_p6, %p3279_p5 }
0x19bc   :  { %3287 = shalt.err (!%p3284_p7)
}
0x19bd   :  { %s3323_s23 = smov 128   ;;  %s3324_s3 = smov 8   ;;  %v2798_v53 = vld [vmem:[%s3857_s16] ss:$0 sm:$0xff]  ;;  %vm2674_vm6 = vcmask 254976  }
0x19be   :  { %2687 = dma.vmem_to_hbm [thread:$0]  %s2682_s22, 256, %s3858_s17, [#allocation3], %s3323_s23, %s3323_s23, %s3324_s3  }
0x19bf   :  { %s3325_s12 = smov [#allocation4]  }
0x19c0   :  { %s2694_s27 = sshll.u32 %s3325_s12, 4  ;;  %s2695_s27 = int_to_ptr.vmem [resolvable:$true] %s2694_s27 }
0x19c1   :  { %s3288_s4 = scalar_lea.vmem %s2695_s27, 32  ;;  %p3293_p9 = scmp.lt.s32.totalorder %s2695_s27, %s2695_s27 }
0x19c2   :  { %p3289_p8 = scmp.ne.s32.totalorder %s2695_s27, %s3288_s4  ;;  %p3294_p10 = scmp.lt.s32.totalorder %s3288_s4, %s3288_s4 }
0x19c4   :  { %p3295_p11 = por %p3294_p10, %p3293_p9 }
0x19c6   :  { %p3296_p12 = pnand %p3295_p11, %p3289_p8 }
0x1a88   :  { %v2669_v54 = vpop.f32.mrb[28].mxu1 }
0x1a89   :  { %v2670_v48 = vadd.f32 %v2798_v53, %v2669_v54  ;;  %v3097_v55 = vpop.f32.mrb[29].mxu1 }
0x1a8b   :  { %3264 = vtanh.f32 %v2670_v48 }
0x1a95   :  { %v3265_v56 = vpop.eup %3264 }
0x1a96   :  { %2675 = vst.msk [vmem:[#allocation4] sm:$0x3] %vm2674_vm6, %v3265_v56 }
0x1a97   :  { %3299 = shalt.err (!%p3296_p12)
}
0x1a98   :  { %s3300_s16 = scalar_lea.hbm %s3859_s18, 32 }
0x1a99   :  { %p3301_p13 = scmp.ne.s32.totalorder %s3859_s18, %s3300_s16  ;;  %p3304_p0 = scmp.lt.u32.totalorder %s3300_s16, %s3859_s18 }
0x1a9b   :  { %p3306_p1 = pnand %p3304_p0, %p3301_p13 }
0x1a9d   :  { %3309 = shalt.err (!%p3306_p1)
}
0x1a9e   :  { %2697 = dma.vmem_to_hbm [thread:$0]  %s2695_s27, 32, %s3859_s18, [#allocation5]  }
0x1a9f   :  { %3310 = dma.done.wait [#allocation3], 256  }
0x1aa0   :  { %3311 = vsyncadd [#allocation3], 4294967040 }
0x1aa1   :  { %3312 = dma.done.wait [#allocation5], 32  }
0x1aa2   :  { %3313 = vsyncadd [#allocation5], 4294967264 }
0x1aa3   :  { %2704 = vsyncpa [#allocation3], 1 }
0x1aa4   :  { %2705 = vsyncpa [#allocation5], 1 }

</bundles_post_ra>
